<compile_context>
chip_gen: v7x
topology: tpu7x:2x2x1
jax: 0.10.0
libtpu: 0.0.40
codegen_flags: <defaults>
</compile_context>

<pallas_src>
import functools

import jax
import jax.numpy as jnp
from jax.experimental import pallas as pl
from jax.experimental.pallas import tpu as pltpu

HIDDEN = 256


def _leaky_relu(x, slope=0.2):
    return jnp.where(x > 0, x, slope * x)


def _mlp_kernel(x_ref, c_ref, w1_ref, w2_ref, small_ref, o_ref):
    mm_dtype = w1_ref.dtype

    # Rows of the stacked small-operand block (f32, resident across grid steps).
    w1_c = small_ref[0:1, :]      # sum of the "c" half of W1, (1, H)
    b1 = small_ref[1:2, :]        # (1, H)
    b2 = small_ref[2:3, :]        # (1, H)
    w3r = small_ref[3:4, :]       # layer-3 weight as a row, (1, H)
    b3 = small_ref[4:5, 0:1]      # (1, 1)

    # Layer 1: Linear(2F -> H) with c folded in algebraically:
    #   h = x @ W1_top + c * sum(W1_bottom, axis=0) + b1
    # x streams in as f32 and is cast on the VPU (free slot, hidden under the
    # MXU) -- no wrapper-side cast pass over x in HBM.
    x = x_ref[...].astype(mm_dtype)
    h = jnp.dot(x, w1_ref[...], preferred_element_type=jnp.float32)
    h = _leaky_relu(h + c_ref[...] * w1_c + b1)

    # Layer 2: Linear(H -> H) + LeakyReLU(0.2).
    h = jnp.dot(h.astype(mm_dtype), w2_ref[...],
                preferred_element_type=jnp.float32)
    h = _leaky_relu(h + b2)

    # Layer 3: Linear(H -> 1) + Sigmoid.  N = 1 => skip the MXU:
    # VPU elementwise multiply + XLU lane reduce, all f32.
    logit = jnp.sum(h * w3r, axis=-1, keepdims=True) + b3     # (tile_b, 1)
    out_col = jax.nn.sigmoid(logit)

    # Lane-dense packed store: one tiny XLU transpose per tile -> (1, tile_b).
    o_ref[...] = jnp.transpose(out_col)


@functools.partial(jax.jit, static_argnames=("tile_b", "use_bf16"))
def conditional_d_forward(x, c, params, tile_b=None, use_bf16=True):
    """Pallas forward pass of conditional_D.

    x: (B, 1, img, img) float32   (NCHW, single channel)
    c: (B,) float32               (per-sample conditioning scalar / label)
    params: dict with w1 (2F,H), b1 (1,H), w2 (H,H), b2 (1,H), w3 (H,1), b3 (1,1)
    returns: (B, 1) float32
    """
    B = x.shape[0]
    F = x.shape[1] * x.shape[2] * x.shape[3]
    H = params["w1"].shape[1]

    if tile_b is None:
        # Single-TC chips (v5e/v6e): one big-M step.  v7x: split two ways once
        # B >= 256 so each TensorCore gets M >= 128.
        half = B // 2
        tile_b = half if (B >= 256 and half % 128 == 0) else B

    assert tile_b % 8 == 0, "tile_b must be a multiple of 8 (f32 sublane)"
    assert B % tile_b == 0, "batch must be divisible by tile_b (pad the batch)"
    assert tile_b == B or tile_b % 128 == 0, (
        "tile_b must be a multiple of 128 unless it spans the whole batch "
        "(lane-dense packed output block)")

    mm_dtype = jnp.bfloat16 if use_bf16 else jnp.float32

    # --- pure glue / weight preprocessing (no per-sample HBM pass over x) ---
    x_flat = x.reshape(B, F)                                      # (B, F) f32
    c2d = c.reshape(B, 1).astype(jnp.float32)                     # (B, 1)

    w1 = params["w1"]                                             # (2F, H)
    w1_top = w1[:F].astype(mm_dtype)                              # (F, H)
    w2m = params["w2"].astype(mm_dtype)                           # (H, H)

    # Stack all small f32 operands behind a single constant BlockSpec:
    # row 0: sum of the "c" half of W1; 1: b1; 2: b2; 3: w3 row; 4: b3 (bcast).
    small = jnp.concatenate(
        [
            jnp.sum(w1[F:], axis=0, keepdims=True),
            params["b1"].reshape(1, H),
            params["b2"].reshape(1, H),
            params["w3"].reshape(1, H),
            jnp.broadcast_to(params["b3"].reshape(1, 1), (1, H)),
        ],
        axis=0,
    ).astype(jnp.float32)                                         # (5, H)

    grid = (B // tile_b,)
    const = lambda i: (0, 0)   # weights stay resident across grid steps

    cost = pl.CostEstimate(
        flops=2 * B * (F * H + H * H + H),
        transcendentals=B,
        bytes_accessed=(x_flat.size * 4 + c2d.size * 4
                        + w1_top.size * w1_top.dtype.itemsize
                        + w2m.size * w2m.dtype.itemsize
                        + small.size * 4 + B * 4),
    )

    out_row = pl.pallas_call(
        _mlp_kernel,
        out_shape=jax.ShapeDtypeStruct((1, B), jnp.float32),
        grid_spec=pltpu.PrefetchScalarGridSpec(
            num_scalar_prefetch=0,
            grid=grid,
            in_specs=[
                pl.BlockSpec((tile_b, F), lambda i: (i, 0)),   # x batch tile (f32)
                pl.BlockSpec((tile_b, 1), lambda i: (i, 0)),   # c batch tile
                pl.BlockSpec((F, H), const),                   # W1_top
                pl.BlockSpec((H, H), const),                   # W2
                pl.BlockSpec((5, H), const),                   # stacked small operands
            ],
            out_specs=pl.BlockSpec((1, tile_b), lambda i: (0, i)),
        ),
        compiler_params=pltpu.CompilerParams(
            dimension_semantics=("parallel",),
        ),
        cost_estimate=cost,
    )(x_flat, c2d, w1_top, w2m, small)

    return out_row.reshape(B, 1)


def init_params(key, img_size, hidden=HIDDEN):
    """Deterministic synthetic parameter init (shapes match nn.Linear's)."""
    in_features = img_size * img_size * 2
    k1, k2, k3 = jax.random.split(key, 3)
    scale1 = 1.0 / jnp.sqrt(in_features)
    scale2 = 1.0 / jnp.sqrt(hidden)
    return {
        "w1": jax.random.uniform(k1, (in_features, hidden), jnp.float32,
                                 -scale1, scale1),
        "b1": jnp.zeros((1, hidden), jnp.float32) + 0.01,
        "w2": jax.random.uniform(k2, (hidden, hidden), jnp.float32,
                                 -scale2, scale2),
        "b2": jnp.zeros((1, hidden), jnp.float32) - 0.01,
        "w3": jax.random.uniform(k3, (hidden, 1), jnp.float32,
                                 -scale2, scale2),
        "b3": jnp.zeros((1, 1), jnp.float32) + 0.05,
    }


def reference_forward_f32(x, c, params):
    """Pure-f32 JAX reference with the exact PyTorch semantics (concat path)."""
    B = x.shape[0]
    x_flat = x.reshape(B, -1)
    c_exp = jnp.broadcast_to(c[:, None], x_flat.shape)
    h = jnp.concatenate([x_flat, c_exp], axis=1)
    h = h @ params["w1"] + params["b1"]
    h = jnp.where(h > 0, h, 0.2 * h)
    h = h @ params["w2"] + params["b2"]
    h = jnp.where(h > 0, h, 0.2 * h)
    return jax.nn.sigmoid(h @ params["w3"] + params["b3"])


def reference_forward_matched(x, c, params, use_bf16=True):
    """Plain-JAX reference using the same folding/quantization as the kernel."""
    B = x.shape[0]
    F = x.shape[1] * x.shape[2] * x.shape[3]
    H = params["w1"].shape[1]
    mm_dtype = jnp.bfloat16 if use_bf16 else jnp.float32

    x_flat = x.reshape(B, F).astype(mm_dtype)
    w1 = params["w1"]
    w1_top = w1[:F].astype(mm_dtype)
    w1_c = jnp.sum(w1[F:], axis=0, keepdims=True)

    h = jnp.dot(x_flat, w1_top, preferred_element_type=jnp.float32)
    h = h + c[:, None] * w1_c + params["b1"].reshape(1, H)
    h = jnp.where(h > 0, h, 0.2 * h)

    h = jnp.dot(h.astype(mm_dtype), params["w2"].astype(mm_dtype),
                preferred_element_type=jnp.float32)
    h = h + params["b2"].reshape(1, H)
    h = jnp.where(h > 0, h, 0.2 * h)

    logit = jnp.sum(h * params["w3"].reshape(1, H), axis=-1, keepdims=True)
    logit = logit + params["b3"].reshape(1, 1)
    return jax.nn.sigmoid(logit)


if __name__ == "__main__":
    # Shapes consistent with the module: single-channel 28x28 image, H=256.
    img_size = 28
    batch = 128   # tile_b auto-selects to 128 -> one big-M grid step

    key = jax.random.PRNGKey(0)
    kx, kc, kp = jax.random.split(key, 3)

    x = jax.random.normal(kx, (batch, 1, img_size, img_size), jnp.float32)
    c = jax.random.randint(kc, (batch,), 0, 10).astype(jnp.float32)  # labels
    params = init_params(kp, img_size)

    out = conditional_d_forward(x, c, params)
    out = jax.block_until_ready(out)
    assert out.shape == (batch, 1), out.shape

    # Tight check against a reference doing the same math / quantization.
    ref_m = reference_forward_matched(x, c, params)
    assert jnp.allclose(out, ref_m, atol=1e-4, rtol=1e-4), (
        f"matched ref max abs err = {float(jnp.max(jnp.abs(out - ref_m)))}"
    )

    # Looser check against the pure-f32 PyTorch-semantics reference
    # (bf16 matmul inputs introduce small, bounded error).
    ref_f32 = reference_forward_f32(x, c, params)
    assert jnp.allclose(out, ref_f32, atol=2e-2), (
        f"f32 ref max abs err = {float(jnp.max(jnp.abs(out - ref_f32)))}"
    )

    print("KERNEL_OK")
</pallas_src>

<mosaic_0001>
module attributes {stable_mosaic.version = 11 : i64} {
  func.func @_mlp_kernel(%arg0: i32, %arg1: memref<128x784xf32, #tpu.memory_space<vmem>>, %arg2: memref<128x1xf32, #tpu.memory_space<vmem>>, %arg3: memref<784x256xbf16, #tpu.memory_space<vmem>>, %arg4: memref<256x256xbf16, #tpu.memory_space<vmem>>, %arg5: memref<5x256xf32, #tpu.memory_space<vmem>>, %arg6: memref<1x128xf32, #tpu.memory_space<vmem>>) attributes {dimension_semantics = [#tpu.dimension_semantics<parallel>], iteration_bounds = array<i64: 1>, scalar_prefetch = 0 : i64, scratch_operands = 0 : i64, tpu.core_type = #tpu.core_type<tc>, window_params = [{transform_indices = @transform_0, window_bounds = array<i64: 128, 784>}, {transform_indices = @transform_1, window_bounds = array<i64: 128, 1>}, {pipeline_mode = #tpu.pipeline_mode<synchronous>, transform_indices = @transform_2, window_bounds = array<i64: 784, 256>}, {pipeline_mode = #tpu.pipeline_mode<synchronous>, transform_indices = @transform_3, window_bounds = array<i64: 256, 256>}, {pipeline_mode = #tpu.pipeline_mode<synchronous>, transform_indices = @transform_4, window_bounds = array<i64: 5, 256>}, {transform_indices = @transform_5, window_bounds = array<i64: 1, 128>}]} {
    %c0 = arith.constant 0 : index
    %c0_0 = arith.constant 0 : index
    %0 = vector.load %arg5[%c0, %c0_0] : memref<5x256xf32, #tpu.memory_space<vmem>>, vector<1x256xf32>
    %c1 = arith.constant 1 : index
    %c0_1 = arith.constant 0 : index
    %1 = vector.load %arg5[%c1, %c0_1] : memref<5x256xf32, #tpu.memory_space<vmem>>, vector<1x256xf32>
    %c2 = arith.constant 2 : index
    %c0_2 = arith.constant 0 : index
    %2 = vector.load %arg5[%c2, %c0_2] : memref<5x256xf32, #tpu.memory_space<vmem>>, vector<1x256xf32>
    %c3 = arith.constant 3 : index
    %c0_3 = arith.constant 0 : index
    %3 = vector.load %arg5[%c3, %c0_3] : memref<5x256xf32, #tpu.memory_space<vmem>>, vector<1x256xf32>
    %c4 = arith.constant 4 : index
    %c0_4 = arith.constant 0 : index
    %4 = vector.load %arg5[%c4, %c0_4] : memref<5x256xf32, #tpu.memory_space<vmem>>, vector<1x1xf32>
    %c0_5 = arith.constant 0 : index
    %c0_6 = arith.constant 0 : index
    %5 = vector.load %arg1[%c0_5, %c0_6] : memref<128x784xf32, #tpu.memory_space<vmem>>, vector<128x784xf32>
    %6 = arith.truncf %5 : vector<128x784xf32> to vector<128x784xbf16>
    %c0_7 = arith.constant 0 : index
    %c0_8 = arith.constant 0 : index
    %7 = vector.load %arg3[%c0_7, %c0_8] : memref<784x256xbf16, #tpu.memory_space<vmem>>, vector<784x256xbf16>
    %cst = arith.constant dense<0.000000e+00> : vector<128x256xf32>
    %8 = tpu.matmul %6, %7, %cst {dimension_numbers = #tpu.dot_dimension_numbers<[1], [0], [0], [1], [0, 0, 1, 1], [], []>} : vector<128x784xbf16>, vector<784x256xbf16>, vector<128x256xf32> -> vector<128x256xf32>
    %c0_9 = arith.constant 0 : index
    %c0_10 = arith.constant 0 : index
    %9 = vector.load %arg2[%c0_9, %c0_10] : memref<128x1xf32, #tpu.memory_space<vmem>>, vector<128x1xf32>
    %10 = vector.broadcast %9 : vector<128x1xf32> to vector<128x256xf32>
    %11 = vector.broadcast %0 : vector<1x256xf32> to vector<128x256xf32>
    %12 = arith.mulf %10, %11 : vector<128x256xf32>
    %13 = arith.addf %8, %12 : vector<128x256xf32>
    %14 = vector.broadcast %1 : vector<1x256xf32> to vector<128x256xf32>
    %15 = arith.addf %13, %14 : vector<128x256xf32>
    %cst_11 = arith.constant 0.000000e+00 : f32
    %16 = vector.broadcast %cst_11 : f32 to vector<128x256xf32>
    %17 = arith.cmpf ogt, %15, %16 : vector<128x256xf32>
    %cst_12 = arith.constant 2.000000e-01 : f32
    %18 = vector.broadcast %cst_12 : f32 to vector<128x256xf32>
    %19 = arith.mulf %18, %15 : vector<128x256xf32>
    %20 = arith.select %17, %15, %19 : vector<128x256xi1>, vector<128x256xf32>
    %21 = arith.truncf %20 : vector<128x256xf32> to vector<128x256xbf16>
    %c0_13 = arith.constant 0 : index
    %c0_14 = arith.constant 0 : index
    %22 = vector.load %arg4[%c0_13, %c0_14] : memref<256x256xbf16, #tpu.memory_space<vmem>>, vector<256x256xbf16>
    %cst_15 = arith.constant dense<0.000000e+00> : vector<128x256xf32>
    %23 = tpu.matmul %21, %22, %cst_15 {dimension_numbers = #tpu.dot_dimension_numbers<[1], [0], [0], [1], [0, 0, 1, 1], [], []>} : vector<128x256xbf16>, vector<256x256xbf16>, vector<128x256xf32> -> vector<128x256xf32>
    %24 = vector.broadcast %2 : vector<1x256xf32> to vector<128x256xf32>
    %25 = arith.addf %23, %24 : vector<128x256xf32>
    %cst_16 = arith.constant 0.000000e+00 : f32
    %26 = vector.broadcast %cst_16 : f32 to vector<128x256xf32>
    %27 = arith.cmpf ogt, %25, %26 : vector<128x256xf32>
    %cst_17 = arith.constant 2.000000e-01 : f32
    %28 = vector.broadcast %cst_17 : f32 to vector<128x256xf32>
    %29 = arith.mulf %28, %25 : vector<128x256xf32>
    %30 = arith.select %27, %25, %29 : vector<128x256xi1>, vector<128x256xf32>
    %31 = vector.broadcast %3 : vector<1x256xf32> to vector<128x256xf32>
    %32 = arith.mulf %30, %31 : vector<128x256xf32>
    %cst_18 = arith.constant dense<0.000000e+00> : vector<128xf32>
    %33 = vector.multi_reduction <add>, %32, %cst_18 [1] : vector<128x256xf32> to vector<128xf32>
    %34 = vector.shape_cast %33 : vector<128xf32> to vector<128x1xf32>
    %35 = vector.broadcast %4 : vector<1x1xf32> to vector<128x1xf32>
    %36 = arith.addf %34, %35 : vector<128x1xf32>
    %37 = arith.negf %36 : vector<128x1xf32>
    %38 = math.exp %37 : vector<128x1xf32>
    %cst_19 = arith.constant 1.000000e+00 : f32
    %39 = vector.broadcast %cst_19 : f32 to vector<128x1xf32>
    %40 = arith.addf %39, %38 : vector<128x1xf32>
    %41 = arith.divf %39, %40 : vector<128x1xf32>
    %42 = tpu.transpose %41, [1, 0] : vector<128x1xf32> -> vector<1x128xf32>
    %c0_20 = arith.constant 0 : index
    %c0_21 = arith.constant 0 : index
    %43 = vector.load %arg6[%c0_20, %c0_21] : memref<1x128xf32, #tpu.memory_space<vmem>>, vector<1x128xf32>
    tpu.vector_store %arg6[%c0_20, %c0_21], %42 {strides = array<i32>} : memref<1x128xf32, #tpu.memory_space<vmem>>, vector<1x128xf32>,
    return
  }
  func.func @transform_0(%arg0: i32) -> (i32, i32) {
    %c0_i32 = arith.constant 0 : i32
    %c0_i32_0 = arith.constant 0 : i32
    return %arg0, %c0_i32 : i32, i32
  }
  func.func @transform_1(%arg0: i32) -> (i32, i32) {
    %c0_i32 = arith.constant 0 : i32
    %c0_i32_0 = arith.constant 0 : i32
    return %arg0, %c0_i32 : i32, i32
  }
  func.func @transform_2(%arg0: i32) -> (i32, i32) {
    %c0_i32 = arith.constant 0 : i32
    %c0_i32_0 = arith.constant 0 : i32
    %c0_i32_1 = arith.constant 0 : i32
    return %c0_i32, %c0_i32_0 : i32, i32
  }
  func.func @transform_3(%arg0: i32) -> (i32, i32) {
    %c0_i32 = arith.constant 0 : i32
    %c0_i32_0 = arith.constant 0 : i32
    %c0_i32_1 = arith.constant 0 : i32
    return %c0_i32, %c0_i32_0 : i32, i32
  }
  func.func @transform_4(%arg0: i32) -> (i32, i32) {
    %c0_i32 = arith.constant 0 : i32
    %c0_i32_0 = arith.constant 0 : i32
    %c0_i32_1 = arith.constant 0 : i32
    return %c0_i32, %c0_i32_0 : i32, i32
  }
  func.func @transform_5(%arg0: i32) -> (i32, i32) {
    %c0_i32 = arith.constant 0 : i32
    %c0_i32_0 = arith.constant 0 : i32
    return %c0_i32, %arg0 : i32, i32
  }
}

</mosaic_0001>

<bundles_post_ra>
// kernel: conditional_d_forward.1
= control target key start
LH: loop header
LB: loop body
LE: loop exit
PB: predicated region body
PF: predicated region fallthrough
CT: control target
= control target key end

     0   :  { %v2791_v56 = vmov 0   ;;  %s3912_s0 = inlined_call_operand.vmem [shape: f32[128,784], index: 0, kind: input, shape index: {}]   ;;  %s3913_s1 = inlined_call_operand.vmem [shape: f32[128,1], index: 1, kind: input, shape index: {}]   ;;  %s3914_s2 = inlined_call_operand.vmem [shape: bf16[784,256], index: 2, kind: input, shape index: {}]   ;;  %s3915_s3 = inlined_call_operand.vmem [shape: bf16[256,256], index: 3, kind: input, shape index: {}]   ;;  %s3916_s4 = inlined_call_operand.vmem [shape: f32[5,256], index: 4, kind: input, shape index: {}]   ;;  %s3917_s5 = inlined_call_operand.hbm [shape: f32[1,128], index: 5, kind: output, shape index: {}]  }
   0x1   :  { %v2508_v0 = vld [vmem:[%s3914_s2 + $0x104] ss:$8 sps:$4 sm:$0xff]   ;;  %v2510_v1 = vld [vmem:[%s3914_s2 + $0x100] ss:$8 sps:$4 sm:$0xff]   ;;  %v2511_v2 = vld [vmem:[%s3914_s2 + $0x114] ss:$8 sps:$4 sm:$0xff]   ;;  %2506 = vset.pattern.permute.xlu0 %v2791_v56  ;;  %2507 = vset.pattern.permute.xlu1 %v2791_v56 }
   0x2   :  { %1063 = vmatprep.subr.bf16.mxu0 %v2508_v0  ;;  %v2513_v3 = vld [vmem:[%s3914_s2 + $0x110] ss:$8 sps:$4 sm:$0xff]   ;;  %v2514_v4 = vld [vmem:[%s3914_s2 + $0x124] ss:$8 sps:$4 sm:$0xff]   ;;  %v2516_v5 = vld [vmem:[%s3914_s2 + $0x120] ss:$8 sps:$4 sm:$0xff]  }
   0x3   :  { %1064 = vmatpush1.bf16.msra.mxu0 %v2510_v1  ;;  %v2517_v6 = vld [vmem:[%s3914_s2 + $0x134] ss:$8 sps:$4 sm:$0xff]   ;;  %v2519_v7 = vld [vmem:[%s3914_s2 + $0x130] ss:$8 sps:$4 sm:$0xff]   ;;  %v2520_v8 = vld [vmem:[%s3914_s2 + $0x144] ss:$8 sps:$4 sm:$0xff]  }
   0x4   :  { %1065 = vmatprep.subr.bf16.mxu0 %v2511_v2  ;;  %v2522_v9 = vld [vmem:[%s3914_s2 + $0x140] ss:$8 sps:$4 sm:$0xff]   ;;  %v2523_v10 = vld [vmem:[%s3914_s2 + $0x154] ss:$8 sps:$4 sm:$0xff]   ;;  %v2525_v11 = vld [vmem:[%s3914_s2 + $0x150] ss:$8 sps:$4 sm:$0xff]  }
   0x5   :  { %v2526_v12 = vld [vmem:[%s3914_s2 + $0x164] ss:$8 sps:$4 sm:$0xff]   ;;  %v33_v13 = vld [vmem:[%s3912_s0 + $0x18] sm:$0xff]  ;;  %v40_v14 = vld [vmem:[%s3912_s0 + $0x50] sm:$0xff] }
   0x6   :  { %v145_v15 = vpack.c.bf16 %v40_v14, %v33_v13  ;;  %v2528_v16 = vld [vmem:[%s3914_s2 + $0x160] ss:$8 sps:$4 sm:$0xff]   ;;  %v2529_v17 = vld [vmem:[%s3914_s2 + $0x174] ss:$8 sps:$4 sm:$0xff]   ;;  %v2562_v18 = vld [vmem:[%s3914_s2 + $0x4] ss:$8 sps:$4 sm:$0xff]  }
   0x7   :  { %1066 = vmatpush1.bf16.msra.mxu0 %v2513_v3  ;;  %v2564_v19 = vld [vmem:[%s3914_s2] ss:$8 sps:$4 sm:$0xff]   ;;  %v2531_v20 = vld [vmem:[%s3914_s2 + $0x170] ss:$8 sps:$4 sm:$0xff]   ;;  %v2532_v21 = vld [vmem:[%s3914_s2 + $0x184] ss:$8 sps:$4 sm:$0xff]   ;;  %950 = vmatprep.subr.bf16.mxu1 %v2562_v18 }
   0x8   :  { %1067 = vmatprep.subr.bf16.mxu0 %v2514_v4  ;;  %1095 = vmatprep.mubr.bf16.mxu0 %v145_v15  ;;  %v2568_v22 = vld [vmem:[%s3914_s2 + $0x14] ss:$8 sps:$4 sm:$0xff]   ;;  %v2570_v23 = vld [vmem:[%s3914_s2 + $0x10] ss:$8 sps:$4 sm:$0xff]   ;;  %v2534_v24 = vld [vmem:[%s3914_s2 + $0x180] ss:$8 sps:$4 sm:$0xff]  }
   0x9   :  { %951 = vmatpush1.bf16.msra.mxu1 %v2564_v19  ;;  %v2535_v25 = vld [vmem:[%s3914_s2 + $0x194] ss:$8 sps:$4 sm:$0xff]   ;;  %v2574_v26 = vld [vmem:[%s3914_s2 + $0x24] ss:$8 sps:$4 sm:$0xff]   ;;  %v2576_v27 = vld [vmem:[%s3914_s2 + $0x20] ss:$8 sps:$4 sm:$0xff]  }
   0xa   :  { %952 = vmatprep.subr.bf16.mxu1 %v2568_v22  ;;  %v2537_v28 = vld [vmem:[%s3914_s2 + $0x190] ss:$8 sps:$4 sm:$0xff]   ;;  %v2538_v29 = vld [vmem:[%s3914_s2 + $0x1a4] ss:$8 sps:$4 sm:$0xff]   ;;  %v2580_v30 = vld [vmem:[%s3914_s2 + $0x34] ss:$8 sps:$4 sm:$0xff]  }
   0xb   :  { %1068 = vmatpush1.bf16.msra.mxu0 %v2516_v5  ;;  %v2582_v31 = vld [vmem:[%s3914_s2 + $0x30] ss:$8 sps:$4 sm:$0xff]   ;;  %v2540_v32 = vld [vmem:[%s3914_s2 + $0x1a0] ss:$8 sps:$4 sm:$0xff]   ;;  %v2586_v33 = vld [vmem:[%s3914_s2 + $0x44] ss:$8 sps:$4 sm:$0xff]  }
   0xc   :  { %1069 = vmatprep.subr.bf16.mxu0 %v2517_v6  ;;  %v2541_v34 = vld [vmem:[%s3914_s2 + $0x1b4] ss:$8 sps:$4 sm:$0xff]   ;;  %v2588_v35 = vld [vmem:[%s3914_s2 + $0x40] ss:$8 sps:$4 sm:$0xff]   ;;  %v2543_v36 = vld [vmem:[%s3914_s2 + $0x1b0] ss:$8 sps:$4 sm:$0xff]  }
   0xd   :  { %953 = vmatpush1.bf16.msra.mxu1 %v2570_v23  ;;  %v2592_v37 = vld [vmem:[%s3914_s2 + $0x54] ss:$8 sps:$4 sm:$0xff]   ;;  %v2544_v38 = vld [vmem:[%s3914_s2 + $0x1c4] ss:$8 sps:$4 sm:$0xff]   ;;  %v2594_v39 = vld [vmem:[%s3914_s2 + $0x50] ss:$8 sps:$4 sm:$0xff]  }
   0xe   :  { %954 = vmatprep.subr.bf16.mxu1 %v2574_v26  ;;  %v2598_v40 = vld [vmem:[%s3914_s2 + $0x64] ss:$8 sps:$4 sm:$0xff]   ;;  %v2546_v41 = vld [vmem:[%s3914_s2 + $0x1c0] ss:$8 sps:$4 sm:$0xff]   ;;  %v2547_v42 = vld [vmem:[%s3914_s2 + $0x1d4] ss:$8 sps:$4 sm:$0xff]  }
   0xf   :  { %1070 = vmatpush1.bf16.msra.mxu0 %v2519_v7  ;;  %v2600_v43 = vld [vmem:[%s3914_s2 + $0x60] ss:$8 sps:$4 sm:$0xff]   ;;  %v2604_v44 = vld [vmem:[%s3914_s2 + $0x74] ss:$8 sps:$4 sm:$0xff]   ;;  %v2549_v45 = vld [vmem:[%s3914_s2 + $0x1d0] ss:$8 sps:$4 sm:$0xff]  }
  0x10   :  { %1071 = vmatprep.subr.bf16.mxu0 %v2520_v8  ;;  %v2550_v46 = vld [vmem:[%s3914_s2 + $0x1e4] ss:$8 sps:$4 sm:$0xff]   ;;  %v2606_v47 = vld [vmem:[%s3914_s2 + $0x70] ss:$8 sps:$4 sm:$0xff]   ;;  %v2552_v49 = vld [vmem:[%s3914_s2 + $0x1e0] ss:$8 sps:$4 sm:$0xff]  }
  0x11   :  { %955 = vmatpush1.bf16.msra.mxu1 %v2576_v27  ;;  %v2610_v48 = vld [vmem:[%s3914_s2 + $0x84] ss:$8 sps:$4 sm:$0xff]   ;;  %v2553_v50 = vld [vmem:[%s3914_s2 + $0x1f4] ss:$8 sps:$4 sm:$0xff]   ;;  %v2612_v51 = vld [vmem:[%s3914_s2 + $0x80] ss:$8 sps:$4 sm:$0xff]  }
  0x12   :  { %956 = vmatprep.subr.bf16.mxu1 %v2580_v30  ;;  %v2555_v52 = vld [vmem:[%s3914_s2 + $0x1f0] ss:$8 sps:$4 sm:$0xff]   ;;  %v2616_v53 = vld [vmem:[%s3914_s2 + $0x94] ss:$8 sps:$4 sm:$0xff]   ;;  %v39_v55 = vld [vmem:[%s3912_s0 + $0x48] sm:$0xff] }
  0x13   :  { %1072 = vmatpush1.bf16.msra.mxu0 %v2522_v9  ;;  %v32_v54 = vld [vmem:[%s3912_s0 + $0x10] sm:$0xff]  ;;  %v2558_v57 = vld [vmem:[%s3914_s2 + $0x204] ss:$8 sps:$4 sm:$0xff]   ;;  %v2556_v63 = vld [vmem:[%s3914_s2 + $0x200] ss:$8 sps:$4 sm:$0xff]  }
  0x14   :  { %1073 = vmatprep.subr.bf16.mxu0 %v2523_v10  ;;  %v47_v58 = vld [vmem:[%s3912_s0 + $0x88] sm:$0xff]  ;;  %v54_v59 = vld [vmem:[%s3912_s0 + $0xc0] sm:$0xff]  ;;  %v2618_v60 = vld [vmem:[%s3914_s2 + $0x90] ss:$8 sps:$4 sm:$0xff]   ;;  %v144_v61 = vpack.c.bf16 %v39_v55, %v32_v54 }
  0x15   :  { %957 = vmatpush1.bf16.msra.mxu1 %v2582_v31  ;;  %v2622_v62 = vld [vmem:[%s3914_s2 + $0xa4] ss:$8 sps:$4 sm:$0xff]   ;;  %v152_v0 = vpack.c.bf16 %v54_v59, %v47_v58  ;;  %v2561_v1 = vld [vmem:[%s3914_s2 + $0x214] ss:$8 sps:$4 sm:$0xff]   ;;  %v2624_v2 = vld [vmem:[%s3914_s2 + $0xa0] ss:$8 sps:$4 sm:$0xff]  }
  0x16   :  { %958 = vmatprep.subr.bf16.mxu1 %v2586_v33  ;;  %v2559_v3 = vld [vmem:[%s3914_s2 + $0x210] ss:$8 sps:$4 sm:$0xff]   ;;  %v46_v4 = vld [vmem:[%s3912_s0 + $0x80] sm:$0xff]  ;;  %v2628_v5 = vld [vmem:[%s3914_s2 + $0xb4] ss:$8 sps:$4 sm:$0xff]  }
  0x17   :  { %1074 = vmatpush1.bf16.msra.mxu0 %v2525_v11  ;;  %v53_v6 = vld [vmem:[%s3912_s0 + $0xb8] sm:$0xff]  ;;  %v2567_v7 = vld [vmem:[%s3914_s2 + $0x224] ss:$8 sps:$4 sm:$0xff]   ;;  %v68_v9 = vld [vmem:[%s3912_s0 + $0x130] sm:$0xff] }
  0x18   :  { %1075 = vmatprep.subr.bf16.mxu0 %v2526_v12  ;;  %v61_v8 = vld [vmem:[%s3912_s0 + $0xf8] sm:$0xff]  ;;  %v151_v11 = vpack.c.bf16 %v53_v6, %v46_v4  ;;  %v2634_v12 = vld [vmem:[%s3914_s2 + $0xc4] ss:$8 sps:$4 sm:$0xff]   ;;  %v2565_v13 = vld [vmem:[%s3914_s2 + $0x220] ss:$8 sps:$4 sm:$0xff]  }
  0x19   :  { %959 = vmatpush1.bf16.msra.mxu1 %v2588_v35  ;;  %v2630_v10 = vld [vmem:[%s3914_s2 + $0xb0] ss:$8 sps:$4 sm:$0xff]   ;;  %v159_v14 = vpack.c.bf16 %v68_v9, %v61_v8  ;;  %v2573_v15 = vld [vmem:[%s3914_s2 + $0x234] ss:$8 sps:$4 sm:$0xff]   ;;  %v2636_v18 = vld [vmem:[%s3914_s2 + $0xc0] ss:$8 sps:$4 sm:$0xff]  }
  0x1a   :  { %960 = vmatprep.subr.bf16.mxu1 %v2592_v37  ;;  %v67_v19 = vld [vmem:[%s3912_s0 + $0x128] sm:$0xff]  ;;  %v82_v23 = vld [vmem:[%s3912_s0 + $0x1a0] sm:$0xff]  ;;  %v2583_v35 = vld [vmem:[%s3914_s2 + $0x250] ss:$8 sps:$4 sm:$0xff]  }
  0x1b   :  { %1076 = vmatpush1.bf16.msra.mxu0 %v2528_v16  ;;  %v2571_v16 = vld [vmem:[%s3914_s2 + $0x230] ss:$8 sps:$4 sm:$0xff]   ;;  %v75_v22 = vld [vmem:[%s3912_s0 + $0x168] sm:$0xff]  ;;  %v38_v26 = vld [vmem:[%s3912_s0 + $0x40] sm:$0xff] }
  0x1c   :  { %1077 = vmatprep.subr.bf16.mxu0 %v2529_v17  ;;  %v60_v17 = vld [vmem:[%s3912_s0 + $0xf0] sm:$0xff]  ;;  %v2577_v30 = vld [vmem:[%s3914_s2 + $0x240] ss:$8 sps:$4 sm:$0xff]   ;;  %v166_v31 = vpack.c.bf16 %v82_v23, %v75_v22  ;;  %v81_v37 = vld [vmem:[%s3912_s0 + $0x198] sm:$0xff] }
  0x1d   :  { %961 = vmatpush1.bf16.msra.mxu1 %v2594_v39  ;;  %v158_v27 = vpack.c.bf16 %v67_v19, %v60_v17  ;;  %v2648_v33 = vld [vmem:[%s3914_s2 + $0xe0] ss:$8 sps:$4 sm:$0xff]   ;;  %v89_v39 = vld [vmem:[%s3912_s0 + $0x1d8] sm:$0xff]  ;;  %v2603_v55 = vld [vmem:[%s3914_s2 + $0x284] ss:$8 sps:$4 sm:$0xff]  }
  0x1e   :  { %962 = vmatprep.subr.bf16.mxu1 %v2598_v40  ;;  %v96_v40 = vld [vmem:[%s3912_s0 + $0x210] sm:$0xff]  ;;  %v95_v54 = vld [vmem:[%s3912_s0 + $0x208] sm:$0xff]  ;;  %v110_v58 = vld [vmem:[%s3912_s0 + $0x280] sm:$0xff] }
  0x1f   :  { %1078 = vmatpush1.bf16.msra.mxu0 %v2531_v20  ;;  %v2640_v20 = vld [vmem:[%s3914_s2 + $0xd4] ss:$8 sps:$4 sm:$0xff]   ;;  %v102_v6 = vld [vmem:[%s3912_s0 + $0x240] sm:$0xff]  ;;  %v123_v22 = vld [vmem:[%s3912_s0 + $0x2e8] sm:$0xff] }
  0x20   :  { %1079 = vmatprep.subr.bf16.mxu0 %v2532_v21  ;;  %v2579_v21 = vld [vmem:[%s3914_s2 + $0x244] ss:$8 sps:$4 sm:$0xff]   ;;  %v44_v59 = vld [vmem:[%s3912_s0 + $0x70] sm:$0xff]  ;;  %v117_v9 = vld [vmem:[%s3912_s0 + $0x2b8] sm:$0xff] }
  0x21   :  { %963 = vmatpush1.bf16.msra.mxu1 %v2600_v43  ;;  %v37_v43 = vld [vmem:[%s3912_s0 + $0x38] sm:$0xff]  ;;  %v2615_v8 = vld [vmem:[%s3914_s2 + $0x2a4] ss:$8 sps:$4 sm:$0xff]  }
  0x22   :  { %964 = vmatprep.subr.bf16.mxu1 %v2604_v44  ;;  %v2621_v17 = vld [vmem:[%s3914_s2 + $0x2b4] ss:$8 sps:$4 sm:$0xff]  }
  0x23   :  { %1080 = vmatpush1.bf16.msra.mxu0 %v2534_v24  ;;  %v2642_v24 = vld [vmem:[%s3914_s2 + $0xd0] ss:$8 sps:$4 sm:$0xff]  }
  0x24   :  { %1081 = vmatprep.subr.bf16.mxu0 %v2535_v25  ;;  %v31_v25 = vld [vmem:[%s3912_s0 + $0x8] sm:$0xff] }
  0x25   :  { %965 = vmatpush1.bf16.msra.mxu1 %v2606_v47  ;;  %v2589_v47 = vld [vmem:[%s3914_s2 + $0x260] ss:$8 sps:$4 sm:$0xff]  }
  0x26   :  { %966 = vmatprep.subr.bf16.mxu1 %v2610_v48  ;;  %v173_v48 = vpack.c.bf16 %v96_v40, %v89_v39 }
  0x27   :  { %1082 = vmatpush1.bf16.msra.mxu0 %v2537_v28  ;;  %v2646_v28 = vld [vmem:[%s3914_s2 + $0xe4] ss:$8 sps:$4 sm:$0xff]  }
  0x28   :  { %1083 = vmatprep.subr.bf16.mxu0 %v2538_v29  ;;  %v143_v29 = vpack.c.bf16 %v38_v26, %v31_v25  ;;  %v131_v25 = vld [vmem:[%s3912_s0 + $0x328] sm:$0xff]  ;;  %v138_v26 = vld [vmem:[%s3912_s0 + $0x360] sm:$0xff] }
  0x29   :  { %967 = vmatpush1.bf16.msra.mxu1 %v2612_v51 }
  0x2a   :  { %968 = vmatprep.subr.bf16.mxu1 %v2616_v53  ;;  %982 = vmatprep.mubr.bf16.mxu1 %v143_v29  ;;  %v88_v53 = vld [vmem:[%s3912_s0 + $0x1d0] sm:$0xff]  ;;  %v87_v29 = vld [vmem:[%s3912_s0 + $0x1c8] sm:$0xff] }
  0x2b   :  { %1084 = vmatpush1.bf16.msra.mxu0 %v2540_v32  ;;  %v2585_v32 = vld [vmem:[%s3914_s2 + $0x254] ss:$8 sps:$4 sm:$0xff]  }
  0x2c   :  { %1085 = vmatprep.subr.bf16.mxu0 %v2541_v34  ;;  %v2652_v34 = vld [vmem:[%s3914_s2 + $0xf4] ss:$8 sps:$4 sm:$0xff]  }
  0x2d   :  { %969 = vmatpush1.bf16.msra.mxu1 %v2618_v60  ;;  %v51_v60 = vld [vmem:[%s3912_s0 + $0xa8] sm:$0xff] }
  0x2e   :  { %970 = vmatprep.subr.bf16.mxu1 %v2622_v62  ;;  %v59_v62 = vld [vmem:[%s3912_s0 + $0xe8] sm:$0xff] }
  0x2f   :  { %1086 = vmatpush1.bf16.msra.mxu0 %v2543_v36  ;;  %v74_v36 = vld [vmem:[%s3912_s0 + $0x160] sm:$0xff] }
  0x30   :  { %1087 = vmatprep.subr.bf16.mxu0 %v2544_v38  ;;  %v2591_v38 = vld [vmem:[%s3914_s2 + $0x264] ss:$8 sps:$4 sm:$0xff]   ;;  %v165_v44 = vpack.c.bf16 %v81_v37, %v74_v36 }
  0x31   :  { %971 = vmatpush1.bf16.msra.mxu1 %v2624_v2  ;;  %v2609_v2 = vld [vmem:[%s3914_s2 + $0x294] ss:$8 sps:$4 sm:$0xff]  }
  0x32   :  { %972 = vmatprep.subr.bf16.mxu1 %v2628_v5  ;;  %v2607_v5 = vld [vmem:[%s3914_s2 + $0x290] ss:$8 sps:$4 sm:$0xff]  }
  0x33   :  { %1088 = vmatpush1.bf16.msra.mxu0 %v2546_v41  ;;  %v2654_v41 = vld [vmem:[%s3914_s2 + $0xf0] ss:$8 sps:$4 sm:$0xff]  }
  0x34   :  { %1089 = vmatprep.subr.bf16.mxu0 %v2547_v42  ;;  %v30_v42 = vld [vmem:[%s3912_s0] sm:$0xff] }
  0x35   :  { %973 = vmatpush1.bf16.msra.mxu1 %v2630_v10  ;;  %v124_v10 = vld [vmem:[%s3912_s0 + $0x2f0] sm:$0xff] }
  0x36   :  { %974 = vmatprep.subr.bf16.mxu1 %v2634_v12  ;;  %v65_v12 = vld [vmem:[%s3912_s0 + $0x118] sm:$0xff] }
  0x37   :  { %1090 = vmatpush1.bf16.msra.mxu0 %v2549_v45  ;;  %v45_v45 = vld [vmem:[%s3912_s0 + $0x78] sm:$0xff] }
  0x38   :  { %1091 = vmatprep.subr.bf16.mxu0 %v2550_v46  ;;  %v52_v46 = vld [vmem:[%s3912_s0 + $0xb0] sm:$0xff] }
  0x39   :  { %975 = vmatpush1.bf16.msra.mxu1 %v2636_v18  ;;  %v150_v51 = vpack.c.bf16 %v52_v46, %v45_v45  ;;  %v187_v18 = vpack.c.bf16 %v124_v10, %v117_v9 }
  0x3a   :  { %976 = vmatprep.subr.bf16.mxu1 %v2640_v20  ;;  %v2619_v20 = vld [vmem:[%s3914_s2 + $0x2b0] ss:$8 sps:$4 sm:$0xff]  }
  0x3b   :  { %1092 = vmatpush1.bf16.msra.mxu0 %v2552_v49  ;;  %v2597_v49 = vld [vmem:[%s3914_s2 + $0x274] ss:$8 sps:$4 sm:$0xff]  }
  0x3c   :  { %1093 = vmatprep.subr.bf16.mxu0 %v2553_v50  ;;  %v142_v50 = vpack.c.bf16 %v37_v43, %v30_v42 }
  0x3d   :  { %977 = vmatpush1.bf16.msra.mxu1 %v2642_v24  ;;  %v2627_v24 = vld [vmem:[%s3914_s2 + $0x2c4] ss:$8 sps:$4 sm:$0xff]  }
  0x3e   :  { %978 = vmatprep.subr.bf16.mxu1 %v2646_v28  ;;  %v79_v28 = vld [vmem:[%s3912_s0 + $0x188] sm:$0xff] }
  0x3f   :  { %1094 = vmatpush1.bf16.msra.mxu0 %v2555_v52  ;;  %v2595_v52 = vld [vmem:[%s3914_s2 + $0x270] ss:$8 sps:$4 sm:$0xff]  }
  0x40   :  { %1176 = vmatprep.subr.bf16.mxu0 %v2558_v57  ;;  %v103_v57 = vld [vmem:[%s3912_s0 + $0x248] sm:$0xff] }
  0x41   :  { %979 = vmatpush1.bf16.msra.mxu1 %v2648_v33  ;;  %v2633_v33 = vld [vmem:[%s3914_s2 + $0x2d4] ss:$8 sps:$4 sm:$0xff]  }
  0x42   :  { %1096 = vmatmul.mubr.bf16.vlgmr.msra.gmra.mrb[0].mxu0 %v144_v61  ;;  %980 = vmatprep.subr.bf16.mxu1 %v2652_v34  ;;  %v172_v61 = vpack.c.bf16 %v95_v54, %v88_v53  ;;  %v194_v34 = vpack.c.bf16 %v138_v26, %v131_v25 }
  0x43   :  { %1177 = vmatpush1.bf16.msra.mxu0 %v2556_v63  ;;  %1105 = vmatprep.mubr.bf16.mxu0 %v152_v0  ;;  %v66_v63 = vld [vmem:[%s3912_s0 + $0x120] sm:$0xff] }
  0x44   :  { %1178 = vmatprep.subr.bf16.mxu0 %v2561_v1  ;;  %v2601_v0 = vld [vmem:[%s3914_s2 + $0x280] ss:$8 sps:$4 sm:$0xff]   ;;  %v180_v1 = vpack.c.bf16 %v110_v58, %v103_v57  ;;  %v157_v4 = vpack.c.bf16 %v66_v63, %v59_v62 }
  0x45   :  { %981 = vmatpush1.bf16.msra.mxu1 %v2654_v41 }
  0x47   :  { %1179 = vmatpush1.bf16.msra.mxu0 %v2559_v3  ;;  %v149_v3 = vpack.c.bf16 %v51_v60, %v44_v59 }
  0x48   :  { %1180 = vmatprep.subr.bf16.mxu0 %v2567_v7  ;;  %983 = vmatmul.mubr.bf16.vlgmr.msra.gmra.mrb[0].mxu1 %v142_v50  ;;  %v109_v7 = vld [vmem:[%s3912_s0 + $0x278] sm:$0xff] }
  0x49   :  { %992 = vmatprep.mubr.bf16.mxu1 %v150_v51 }
  0x4a   :  { %1106 = vmatmul.mubr.bf16.gmra.mrb[4].mxu0 %v151_v11  ;;  %v58_v11 = vld [vmem:[%s3912_s0 + $0xe0] sm:$0xff] }
  0x4b   :  { %1181 = vmatpush1.bf16.msra.mxu0 %v2565_v13  ;;  %1115 = vmatprep.mubr.bf16.mxu0 %v159_v14  ;;  %v73_v13 = vld [vmem:[%s3912_s0 + $0x158] sm:$0xff]  ;;  %v2613_v14 = vld [vmem:[%s3914_s2 + $0x2a0] ss:$8 sps:$4 sm:$0xff]   ;;  %v156_v19 = vpack.c.bf16 %v65_v12, %v58_v11 }
  0x4c   :  { %1182 = vmatprep.subr.bf16.mxu0 %v2573_v15  ;;  %v80_v15 = vld [vmem:[%s3912_s0 + $0x190] sm:$0xff] }
  0x4d   :  { %v164_v23 = vpack.c.bf16 %v80_v15, %v73_v13 }
  0x4f   :  { %1183 = vmatpush1.bf16.msra.mxu0 %v2571_v16  ;;  %v179_v16 = vpack.c.bf16 %v109_v7, %v102_v6 }
  0x50   :  { %1184 = vmatprep.subr.bf16.mxu0 %v2579_v21  ;;  %993 = vmatmul.mubr.bf16.gmra.mrb[4].mxu1 %v149_v3  ;;  %v116_v21 = vld [vmem:[%s3912_s0 + $0x2b0] sm:$0xff] }
  0x51   :  { %1002 = vmatprep.mubr.bf16.mxu1 %v157_v4 }
  0x52   :  { %1116 = vmatmul.mubr.bf16.gmra.mrb[8].mxu0 %v158_v27  ;;  %v72_v27 = vld [vmem:[%s3912_s0 + $0x150] sm:$0xff] }
  0x53   :  { %1185 = vmatpush1.bf16.msra.mxu0 %v2577_v30  ;;  %1125 = vmatprep.mubr.bf16.mxu0 %v166_v31  ;;  %v94_v30 = vld [vmem:[%s3912_s0 + $0x200] sm:$0xff] }
  0x54   :  { %1186 = vmatprep.subr.bf16.mxu0 %v2585_v32  ;;  %v2625_v31 = vld [vmem:[%s3914_s2 + $0x2c0] ss:$8 sps:$4 sm:$0xff]   ;;  %v186_v32 = vpack.c.bf16 %v123_v22, %v116_v21 }
  0x57   :  { %1187 = vmatpush1.bf16.msra.mxu0 %v2583_v35  ;;  %v163_v35 = vpack.c.bf16 %v79_v28, %v72_v27 }
  0x58   :  { %1188 = vmatprep.subr.bf16.mxu0 %v2591_v38  ;;  %1003 = vmatmul.mubr.bf16.gmra.mrb[8].mxu1 %v156_v19 }
  0x59   :  { %1012 = vmatprep.mubr.bf16.mxu1 %v164_v23 }
  0x5a   :  { %1126 = vmatmul.mubr.bf16.gmra.mrb[12].mxu0 %v165_v44 }
  0x5b   :  { %1189 = vmatpush1.bf16.msra.mxu0 %v2589_v47  ;;  %1135 = vmatprep.mubr.bf16.mxu0 %v173_v48 }
  0x5c   :  { %1190 = vmatprep.subr.bf16.mxu0 %v2597_v49 }
  0x5f   :  { %1191 = vmatpush1.bf16.msra.mxu0 %v2595_v52 }
  0x60   :  { %1192 = vmatprep.subr.bf16.mxu0 %v2603_v55 }
  0x62   :  { %1136 = vmatmul.mubr.bf16.gmra.mrb[16].mxu0 %v172_v61 }
  0x63   :  { %1193 = vmatpush1.bf16.msra.mxu0 %v2601_v0  ;;  %1145 = vmatprep.mubr.bf16.mxu0 %v180_v1 }
  0x64   :  { %1194 = vmatprep.subr.bf16.mxu0 %v2609_v2 }
  0x67   :  { %1195 = vmatpush1.bf16.msra.mxu0 %v2607_v5 }
  0x68   :  { %1196 = vmatprep.subr.bf16.mxu0 %v2615_v8 }
  0x6a   :  { %1146 = vmatmul.mubr.bf16.gmra.mrb[20].mxu0 %v179_v16 }
  0x6b   :  { %1197 = vmatpush1.bf16.msra.mxu0 %v2613_v14  ;;  %1155 = vmatprep.mubr.bf16.mxu0 %v187_v18 }
  0x6c   :  { %1198 = vmatprep.subr.bf16.mxu0 %v2621_v17 }
  0x6f   :  { %1199 = vmatpush1.bf16.msra.mxu0 %v2619_v20 }
  0x70   :  { %1200 = vmatprep.subr.bf16.mxu0 %v2627_v24 }
  0x71   :  { %10 = vsyncpa [#allocation3], 0  ;;  %v171_v36 = vpack.c.bf16 %v94_v30, %v87_v29  ;;  %v296_v37 = vld [vmem:[%s3913_s1] sm:$0xff]  ;;  %v2631_v38 = vld [vmem:[%s3914_s2 + $0x2d0] ss:$8 sps:$4 sm:$0xff]   ;;  %1013 = vmatmul.mubr.bf16.gmra.mrb[12].mxu1 %v163_v35  ;;  %vm925_vm0 = vcmask 130048  }
  0x72   :  { %1156 = vmatmul.mubr.bf16.gmra.mrb[24].mxu0 %v186_v32  ;;  %v130_v39 = vld [vmem:[%s3912_s0 + $0x320] sm:$0xff]  ;;  %v137_v40 = vld [vmem:[%s3912_s0 + $0x358] sm:$0xff]  ;;  %v35_v42 = vld [vmem:[%s3912_s0 + $0x28] sm:$0xff]  ;;  %314 = vperm.xlu0 %2506, %v296_v37  }
  0x73   :  { %1201 = vmatpush1.bf16.msra.mxu0 %v2625_v31  ;;  %1165 = vmatprep.mubr.bf16.mxu0 %v194_v34  ;;  %v2639_v41 = vld [vmem:[%s3914_s2 + $0x2e4] ss:$8 sps:$4 sm:$0xff]   ;;  %v93_v45 = vld [vmem:[%s3912_s0 + $0x1f8] sm:$0xff]  ;;  %v193_v46 = vpack.c.bf16 %v137_v40, %v130_v39  ;;  %v108_v48 = vld [vmem:[%s3912_s0 + $0x270] sm:$0xff] }
  0x74   :  { %1202 = vmatprep.subr.bf16.mxu0 %v2633_v33  ;;  %v42_v43 = vld [vmem:[%s3912_s0 + $0x60] sm:$0xff]  ;;  %1022 = vmatprep.mubr.bf16.mxu1 %v171_v36  ;;  %v101_v47 = vld [vmem:[%s3912_s0 + $0x238] sm:$0xff]  ;;  %v297_v49 = vld [vmem:[%s3913_s1 + $0x8] sm:$0xff] }
  0x75   :  { %v86_v44 = vld [vmem:[%s3912_s0 + $0x1c0] sm:$0xff]  ;;  %v147_v51 = vpack.c.bf16 %v42_v43, %v35_v42  ;;  %v2645_v52 = vld [vmem:[%s3914_s2 + $0x2f4] ss:$8 sps:$4 sm:$0xff]   ;;  %v178_v54 = vpack.c.bf16 %v108_v48, %v101_v47  ;;  %v2643_v55 = vld [vmem:[%s3914_s2 + $0x2f0] ss:$8 sps:$4 sm:$0xff]  }
  0x76   :  { %v2637_v50 = vld [vmem:[%s3914_s2 + $0x2e0] ss:$8 sps:$4 sm:$0xff]   ;;  %v170_v53 = vpack.c.bf16 %v93_v45, %v86_v44  ;;  %319 = vperm.xlu0 %2506, %v297_v49   ;;  %v298_v57 = vld [vmem:[%s3913_s1 + $0x10] sm:$0xff]  ;;  %v41_v59 = vld [vmem:[%s3912_s0 + $0x58] sm:$0xff] }
  0x77   :  { %1203 = vmatpush1.bf16.msra.mxu0 %v2631_v38  ;;  %v34_v58 = vld [vmem:[%s3912_s0 + $0x20] sm:$0xff]  ;;  %v49_v62 = vld [vmem:[%s3912_s0 + $0x98] sm:$0xff]  ;;  %v56_v63 = vld [vmem:[%s3912_s0 + $0xd0] sm:$0xff]  ;;  %324 = vperm.xlu1 %2507, %v298_v57  }
  0x78   :  { %1204 = vmatprep.subr.bf16.mxu0 %v2639_v41  ;;  %v300_v60 = vld [vmem:[%s3913_s1 + $0x20] sm:$0xff]  ;;  %v100_v0 = vld [vmem:[%s3912_s0 + $0x230] sm:$0xff]  ;;  %v107_v1 = vld [vmem:[%s3912_s0 + $0x268] sm:$0xff]  ;;  %v146_v2 = vpack.c.bf16 %v41_v59, %v34_v58  ;;  %v154_v7 = vpack.c.bf16 %v56_v63, %v49_v62 }
  0x79   :  { %v2651_v61 = vld [vmem:[%s3914_s2 + $0x304] ss:$8 sps:$4 sm:$0xff]   ;;  %1023 = vmatmul.mubr.bf16.gmra.mrb[16].mxu1 %v170_v53  ;;  %v299_v5 = vld [vmem:[%s3913_s1 + $0x18] sm:$0xff]  ;;  %v2649_v6 = vld [vmem:[%s3914_s2 + $0x300] ss:$8 sps:$4 sm:$0xff]   ;;  %v177_v10 = vpack.c.bf16 %v107_v1, %v100_v0 }
  0x7a   :  { %1166 = vmatmul.mubr.bf16.gmra.mrb[28].mxu0 %v193_v46  ;;  %1032 = vmatprep.mubr.bf16.mxu1 %v178_v54  ;;  %v115_v3 = vld [vmem:[%s3912_s0 + $0x2a8] sm:$0xff]  ;;  %v122_v4 = vld [vmem:[%s3912_s0 + $0x2e0] sm:$0xff]  ;;  %v302_v8 = vld [vmem:[%s3913_s1 + $0x30] sm:$0xff] }
  0x7b   :  { %1205 = vmatpush1.bf16.msra.mxu0 %v2637_v50  ;;  %1208 = vmatprep.mubr.bf16.mxu0 %v147_v51  ;;  %v2657_v9 = vld [vmem:[%s3915_s3 + $0x4] ss:$8 sps:$4 sm:$0xff]   ;;  %v185_v11 = vpack.c.bf16 %v122_v4, %v115_v3  ;;  %v48_v12 = vld [vmem:[%s3912_s0 + $0x90] sm:$0xff]  ;;  %v2655_v14 = vld [vmem:[%s3915_s3] ss:$8 sps:$4 sm:$0xff]  }
  0x7c   :  { %1206 = vmatprep.subr.bf16.mxu0 %v2645_v52  ;;  %334 = vperm.xlu0 %2506, %v300_v60   ;;  %v301_v13 = vld [vmem:[%s3913_s1 + $0x28] sm:$0xff]  ;;  %v304_v16 = vld [vmem:[%s3913_s1 + $0x40] sm:$0xff]  ;;  %v2660_v17 = vld [vmem:[%s3915_s3 + $0x14] ss:$8 sps:$4 sm:$0xff]  }
  0x7d   :  { %329 = vperm.xlu1 %2507, %v299_v5   ;;  %1760 = vmatprep.subr.bf16.mxu1 %v2657_v9  ;;  %v55_v15 = vld [vmem:[%s3912_s0 + $0xc8] sm:$0xff]  ;;  %v70_v19 = vld [vmem:[%s3912_s0 + $0x140] sm:$0xff]  ;;  %v121_v21 = vld [vmem:[%s3912_s0 + $0x2d8] sm:$0xff] }
  0x7e   :  { %v63_v18 = vld [vmem:[%s3912_s0 + $0x108] sm:$0xff]  ;;  %v114_v20 = vld [vmem:[%s3912_s0 + $0x2a0] sm:$0xff]  ;;  %v153_v22 = vpack.c.bf16 %v55_v15, %v48_v12  ;;  %v129_v23 = vld [vmem:[%s3912_s0 + $0x318] sm:$0xff]  ;;  %1761 = vmatpush1.bf16.msra.mxu1 %v2655_v14 }
  0x7f   :  { %1207 = vmatpush1.bf16.msra.mxu0 %v2643_v55  ;;  %v136_v24 = vld [vmem:[%s3912_s0 + $0x350] sm:$0xff]  ;;  %v303_v25 = vld [vmem:[%s3913_s1 + $0x38] sm:$0xff]  ;;  %v161_v26 = vpack.c.bf16 %v70_v19, %v63_v18  ;;  %1762 = vmatprep.subr.bf16.mxu1 %v2660_v17  ;;  %v184_v29 = vpack.c.bf16 %v121_v21, %v114_v20  ;;  %v2663_v30 = vld [vmem:[%s3915_s3 + $0x24] ss:$8 sps:$4 sm:$0xff]  }
  0x80   :  { %1289 = vmatprep.subr.bf16.mxu0 %v2651_v61  ;;  %344 = vperm.xlu0 %2506, %v302_v8   ;;  %v306_v27 = vld [vmem:[%s3913_s1 + $0x50] sm:$0xff]  ;;  %v192_v31 = vpack.c.bf16 %v136_v24, %v129_v23  ;;  %v62_v32 = vld [vmem:[%s3912_s0 + $0x100] sm:$0xff]  ;;  %v305_v33 = vld [vmem:[%s3913_s1 + $0x48] sm:$0xff] }
  0x81   :  { %1033 = vmatmul.mubr.bf16.gmra.mrb[20].mxu1 %v177_v10  ;;  %339 = vperm.xlu1 %2507, %v301_v13   ;;  %v2658_v28 = vld [vmem:[%s3915_s3 + $0x10] ss:$8 sps:$4 sm:$0xff]   ;;  %v308_v35 = vld [vmem:[%s3913_s1 + $0x60] sm:$0xff]  ;;  %v2666_v39 = vld [vmem:[%s3915_s3 + $0x34] ss:$8 sps:$4 sm:$0xff]  }
  0x82   :  { %1209 = vmatmul.mubr.bf16.vlgmr.msra.gmra.mrb[0].mxu0 %v146_v2  ;;  %1042 = vmatprep.mubr.bf16.mxu1 %v185_v11  ;;  %v69_v34 = vld [vmem:[%s3912_s0 + $0x138] sm:$0xff]  ;;  %v2661_v36 = vld [vmem:[%s3915_s3 + $0x20] ss:$8 sps:$4 sm:$0xff]   ;;  %v84_v38 = vld [vmem:[%s3912_s0 + $0x1b0] sm:$0xff] }
  0x83   :  { %1290 = vmatpush1.bf16.msra.mxu0 %v2649_v6  ;;  %1218 = vmatprep.mubr.bf16.mxu0 %v154_v7  ;;  %v77_v37 = vld [vmem:[%s3912_s0 + $0x178] sm:$0xff]  ;;  %v128_v40 = vld [vmem:[%s3912_s0 + $0x310] sm:$0xff]  ;;  %v135_v41 = vld [vmem:[%s3912_s0 + $0x348] sm:$0xff]  ;;  %v160_v42 = vpack.c.bf16 %v69_v34, %v62_v32 }
  0x84   :  { %354 = vperm.xlu0 %2506, %v304_v16   ;;  %1763 = vmatpush1.bf16.msra.mxu1 %v2658_v28  ;;  %v307_v43 = vld [vmem:[%s3913_s1 + $0x58] sm:$0xff]  ;;  %v168_v44 = vpack.c.bf16 %v84_v38, %v77_v37  ;;  %v310_v45 = vld [vmem:[%s3913_s1 + $0x70] sm:$0xff]  ;;  %v191_v47 = vpack.c.bf16 %v135_v41, %v128_v40  ;;  %v2669_v48 = vld [vmem:[%s3915_s3 + $0x44] ss:$8 sps:$4 sm:$0xff]  }
  0x85   :  { %349 = vperm.xlu1 %2507, %v303_v25   ;;  %1764 = vmatprep.subr.bf16.mxu1 %v2663_v30  ;;  %v2664_v46 = vld [vmem:[%s3915_s3 + $0x30] ss:$8 sps:$4 sm:$0xff]   ;;  %v309_v49 = vld [vmem:[%s3913_s1 + $0x68] sm:$0xff]  ;;  %v98_v54 = vld [vmem:[%s3912_s0 + $0x220] sm:$0xff] }
  0x86   :  { %v76_v50 = vld [vmem:[%s3912_s0 + $0x170] sm:$0xff]  ;;  %v83_v51 = vld [vmem:[%s3912_s0 + $0x1a8] sm:$0xff]  ;;  %v311_v57 = vld [vmem:[%s3913_s1 + $0x78] sm:$0xff] }
  0x87   :  { %v2667_v52 = vld [vmem:[%s3915_s3 + $0x40] ss:$8 sps:$4 sm:$0xff]   ;;  %v167_v55 = vpack.c.bf16 %v83_v51, %v76_v50  ;;  %v97_v60 = vld [vmem:[%s3912_s0 + $0x218] sm:$0xff]  ;;  %v112_v62 = vld [vmem:[%s3912_s0 + $0x290] sm:$0xff] }
  0x88   :  { %364 = vperm.xlu0 %2506, %v306_v27   ;;  %1765 = vmatpush1.bf16.msra.mxu1 %v2661_v36  ;;  %v91_v53 = vld [vmem:[%s3912_s0 + $0x1e8] sm:$0xff]  ;;  %v90_v59 = vld [vmem:[%s3912_s0 + $0x1e0] sm:$0xff]  ;;  %v105_v61 = vld [vmem:[%s3912_s0 + $0x258] sm:$0xff] }
  0x89   :  { %1043 = vmatmul.mubr.bf16.gmra.mrb[24].mxu1 %v184_v29  ;;  %359 = vperm.xlu1 %2507, %v305_v33   ;;  %v175_v58 = vpack.c.bf16 %v98_v54, %v91_v53  ;;  %v174_v63 = vpack.c.bf16 %v97_v60, %v90_v59  ;;  %v182_v0 = vpack.c.bf16 %v112_v62, %v105_v61  ;;  %v104_v1 = vld [vmem:[%s3912_s0 + $0x250] sm:$0xff]  ;;  %v111_v2 = vld [vmem:[%s3912_s0 + $0x288] sm:$0xff]  ;;  %v126_v4 = vld [vmem:[%s3912_s0 + $0x300] sm:$0xff] }
  0x8a   :  { %1219 = vmatmul.mubr.bf16.gmra.mrb[4].mxu0 %v153_v22  ;;  %1052 = vmatprep.mubr.bf16.mxu1 %v192_v31  ;;  %v119_v3 = vld [vmem:[%s3912_s0 + $0x2c8] sm:$0xff]  ;;  %v181_v5 = vpack.c.bf16 %v111_v2, %v104_v1  ;;  %v118_v7 = vld [vmem:[%s3912_s0 + $0x2c0] sm:$0xff]  ;;  %v125_v8 = vld [vmem:[%s3912_s0 + $0x2f8] sm:$0xff] }
  0x8b   :  { %1228 = vmatprep.mubr.bf16.mxu0 %v161_v26  ;;  %1766 = vmatprep.subr.bf16.mxu1 %v2666_v39  ;;  %v189_v6 = vpack.c.bf16 %v126_v4, %v119_v3  ;;  %v133_v9 = vld [vmem:[%s3912_s0 + $0x338] sm:$0xff]  ;;  %v140_v10 = vld [vmem:[%s3912_s0 + $0x370] sm:$0xff]  ;;  %v188_v11 = vpack.c.bf16 %v125_v8, %v118_v7  ;;  %v139_v16 = vld [vmem:[%s3912_s0 + $0x368] sm:$0xff] }
  0x8c   :  { %374 = vperm.xlu0 %2506, %v308_v35   ;;  %1767 = vmatpush1.bf16.msra.mxu1 %v2664_v46  ;;  %v196_v12 = vpack.c.bf16 %v140_v10, %v133_v9  ;;  %v2670_v13 = vld [vmem:[%s3915_s3 + $0x50] ss:$8 sps:$4 sm:$0xff]   ;;  %v2672_v14 = vld [vmem:[%s3915_s3 + $0x54] ss:$8 sps:$4 sm:$0xff]   ;;  %v2673_v18 = vld [vmem:[%s3915_s3 + $0x60] ss:$8 sps:$4 sm:$0xff]  }
  0x8d   :  { %369 = vperm.xlu1 %2507, %v307_v43   ;;  %1768 = vmatprep.subr.bf16.mxu1 %v2669_v48  ;;  %v132_v15 = vld [vmem:[%s3912_s0 + $0x330] sm:$0xff]  ;;  %v2675_v19 = vld [vmem:[%s3915_s3 + $0x64] ss:$8 sps:$4 sm:$0xff]   ;;  %v57_v26 = vld [vmem:[%s3912_s0 + $0xd8] sm:$0xff] }
  0x8e   :  { %v195_v17 = vpack.c.bf16 %v139_v16, %v132_v15  ;;  %v36_v20 = vld [vmem:[%s3912_s0 + $0x30] sm:$0xff]  ;;  %v43_v21 = vld [vmem:[%s3912_s0 + $0x68] sm:$0xff]  ;;  %v50_v25 = vld [vmem:[%s3912_s0 + $0xa0] sm:$0xff] }
  0x8f   :  { %v148_v22 = vpack.c.bf16 %v43_v21, %v36_v20  ;;  %v2676_v23 = vld [vmem:[%s3915_s3 + $0x70] ss:$8 sps:$4 sm:$0xff]   ;;  %v2678_v24 = vld [vmem:[%s3915_s3 + $0x74] ss:$8 sps:$4 sm:$0xff]   ;;  %v155_v27 = vpack.c.bf16 %v57_v26, %v50_v25  ;;  %v2679_v28 = vld [vmem:[%s3915_s3 + $0x80] ss:$8 sps:$4 sm:$0xff]  }
  0x90   :  { %384 = vperm.xlu0 %2506, %v310_v45   ;;  %1769 = vmatpush1.bf16.msra.mxu1 %v2667_v52  ;;  %v2681_v29 = vld [vmem:[%s3915_s3 + $0x84] ss:$8 sps:$4 sm:$0xff]   ;;  %v64_v30 = vld [vmem:[%s3912_s0 + $0x110] sm:$0xff]  ;;  %v85_v36 = vld [vmem:[%s3912_s0 + $0x1b8] sm:$0xff] }
  0x91   :  { %1053 = vmatmul.mubr.bf16.gmra.mrb[28].mxu1 %v191_v47  ;;  %379 = vperm.xlu1 %2507, %v309_v49   ;;  %v71_v31 = vld [vmem:[%s3912_s0 + $0x148] sm:$0xff]  ;;  %v2682_v33 = vld [vmem:[%s3915_s3 + $0x90] ss:$8 sps:$4 sm:$0xff]   ;;  %v2684_v34 = vld [vmem:[%s3915_s3 + $0x94] ss:$8 sps:$4 sm:$0xff]  }
  0x92   :  { %1229 = vmatmul.mubr.bf16.gmra.mrb[8].mxu0 %v160_v42  ;;  %1770 = vmatprep.subr.bf16.mxu1 %v2672_v14  ;;  %v162_v32 = vpack.c.bf16 %v71_v31, %v64_v30  ;;  %v78_v35 = vld [vmem:[%s3912_s0 + $0x180] sm:$0xff]  ;;  %v92_v40 = vld [vmem:[%s3912_s0 + $0x1f0] sm:$0xff]  ;;  %v99_v41 = vld [vmem:[%s3912_s0 + $0x228] sm:$0xff]  ;;  %v393_v30 = vlaneseq }
  0x93   :  { %1238 = vmatprep.mubr.bf16.mxu0 %v168_v44  ;;  %v169_v37 = vpack.c.bf16 %v85_v36, %v78_v35  ;;  %v2685_v38 = vld [vmem:[%s3915_s3 + $0xa0] ss:$8 sps:$4 sm:$0xff]   ;;  %v2687_v39 = vld [vmem:[%s3915_s3 + $0xa4] ss:$8 sps:$4 sm:$0xff]   ;;  %v176_v42 = vpack.c.bf16 %v99_v41, %v92_v40  ;;  %v2688_v43 = vld [vmem:[%s3915_s3 + $0xb0] ss:$8 sps:$4 sm:$0xff]  }
  0x94   :  { %1771 = vmatpush1.bf16.msra.mxu1 %v2670_v13  ;;  %v2690_v44 = vld [vmem:[%s3915_s3 + $0xb4] ss:$8 sps:$4 sm:$0xff]   ;;  %v106_v45 = vld [vmem:[%s3912_s0 + $0x260] sm:$0xff]  ;;  %v127_v51 = vld [vmem:[%s3912_s0 + $0x308] sm:$0xff]  ;;  %v394_v31 = vshrl.u32 %v393_v30, 7 }
  0x95   :  { %389 = vperm.xlu1 %2507, %v311_v57   ;;  %1772 = vmatprep.subr.bf16.mxu1 %v2675_v19  ;;  %v113_v46 = vld [vmem:[%s3912_s0 + $0x298] sm:$0xff]  ;;  %v2691_v48 = vld [vmem:[%s3915_s3 + $0xc0] ss:$8 sps:$4 sm:$0xff]   ;;  %v2693_v49 = vld [vmem:[%s3915_s3 + $0xc4] ss:$8 sps:$4 sm:$0xff]  }
  0x96   :  { %v183_v47 = vpack.c.bf16 %v113_v46, %v106_v45  ;;  %v120_v50 = vld [vmem:[%s3912_s0 + $0x2d0] sm:$0xff]  ;;  %v134_v53 = vld [vmem:[%s3912_s0 + $0x340] sm:$0xff]  ;;  %v141_v54 = vld [vmem:[%s3912_s0 + $0x378] sm:$0xff] }
  0x97   :  { %v190_v52 = vpack.c.bf16 %v127_v51, %v120_v50  ;;  %v2696_v57 = vld [vmem:[%s3915_s3 + $0xd4] ss:$8 sps:$4 sm:$0xff]   ;;  %v2697_v59 = vld [vmem:[%s3915_s3 + $0xe0] ss:$8 sps:$4 sm:$0xff]   ;;  %v2700_v61 = vld [vmem:[%s3915_s3 + $0xf0] ss:$8 sps:$4 sm:$0xff]  }
  0x98   :  { %1773 = vmatpush1.bf16.msra.mxu1 %v2673_v18  ;;  %v2702_v60 = vld [vmem:[%s3915_s3 + $0xf4] ss:$8 sps:$4 sm:$0xff]   ;;  %v2219_v41 = vld [vmem:[%s3916_s4 + $0x1] ss:$8 sm:$0x3] }
  0x99   :  { %1774 = vmatprep.subr.bf16.mxu1 %v2678_v24 }
  0x9a   :  { %1239 = vmatmul.mubr.bf16.gmra.mrb[12].mxu0 %v167_v55  ;;  %v197_v55 = vpack.c.bf16 %v141_v54, %v134_v53 }
  0x9b   :  { %1248 = vmatprep.mubr.bf16.mxu0 %v175_v58  ;;  %v2694_v58 = vld [vmem:[%s3915_s3 + $0xd0] ss:$8 sps:$4 sm:$0xff]  }
  0x9c   :  { %1775 = vmatpush1.bf16.msra.mxu1 %v2676_v23 }
  0x9d   :  { %1776 = vmatprep.subr.bf16.mxu1 %v2681_v29 }
  0xa0   :  { %1777 = vmatpush1.bf16.msra.mxu1 %v2679_v28 }
  0xa1   :  { %1778 = vmatprep.subr.bf16.mxu1 %v2684_v34  ;;  %v3676_v34 = vsub.s32 1, %v394_v31 }
  0xa2   :  { %1249 = vmatmul.mubr.bf16.gmra.mrb[16].mxu0 %v174_v63 }
  0xa3   :  { %1258 = vmatprep.mubr.bf16.mxu0 %v182_v0 }
  0xa4   :  { %1779 = vmatpush1.bf16.msra.mxu1 %v2682_v33  ;;  %v22_v33 = vld [vmem:[%s3916_s4] ss:$8 sm:$0x3] }
  0xa5   :  { %1780 = vmatprep.subr.bf16.mxu1 %v2687_v39 }
  0xa8   :  { %1781 = vmatpush1.bf16.msra.mxu1 %v2685_v38 }
  0xa9   :  { %1782 = vmatprep.subr.bf16.mxu1 %v2690_v44 }
  0xaa   :  { %1259 = vmatmul.mubr.bf16.gmra.mrb[20].mxu0 %v181_v5 }
  0xab   :  { %1268 = vmatprep.mubr.bf16.mxu0 %v189_v6 }
  0xac   :  { %1783 = vmatpush1.bf16.msra.mxu1 %v2688_v43 }
  0xad   :  { %1784 = vmatprep.subr.bf16.mxu1 %v2693_v49  ;;  %v3695_v49 = vrot.slane %v2219_v41, %v3676_v34 }
  0xb0   :  { %1785 = vmatpush1.bf16.msra.mxu1 %v2691_v48 }
  0xb1   :  { %1786 = vmatprep.subr.bf16.mxu1 %v2696_v57 }
  0xb2   :  { %1269 = vmatmul.mubr.bf16.gmra.mrb[24].mxu0 %v188_v11 }
  0xb3   :  { %1278 = vmatprep.mubr.bf16.mxu0 %v196_v12 }
  0xb4   :  { %1787 = vmatpush1.bf16.msra.mxu1 %v2694_v58 }
  0xba   :  { %1279 = vmatmul.mubr.bf16.gmra.mrb[28].mxu0 %v195_v17 }
  0xbb   :  { %1321 = vmatprep.mubr.bf16.mxu0 %v2791_v56 }
  0xc2   :  { %2320 = vmatmul.mubr.msk.bf16.vlgmr.msra.gmra.mrb[0].mxu0 %vm925_vm0, %v148_v22 }
  0xc3   :  { %1331 = vmatprep.mubr.bf16.mxu0 %v2791_v56 }
  0xca   :  { %2321 = vmatmul.mubr.msk.bf16.gmra.mrb[4].mxu0 %vm925_vm0, %v155_v27 }
  0xcb   :  { %1341 = vmatprep.mubr.bf16.mxu0 %v2791_v56 }
  0xd2   :  { %2322 = vmatmul.mubr.msk.bf16.gmra.mrb[8].mxu0 %vm925_vm0, %v162_v32  ;;  %v3671_v32 = vsub.s32 0, %v394_v31 }
  0xd3   :  { %1351 = vmatprep.mubr.bf16.mxu0 %v2791_v56 }
  0xd4   :  { %v3679_v35 = vrot.slane %v22_v33, %v3671_v32  ;;  %v3692_v46 = vrot.slane %v2219_v41, %v3671_v32 }
  0xda   :  { %2323 = vmatmul.mubr.msk.bf16.gmra.mrb[12].mxu0 %vm925_vm0, %v169_v37  ;;  %v3682_v37 = vrot.slane %v22_v33, %v3676_v34 }
  0xdb   :  { %1361 = vmatprep.mubr.bf16.mxu0 %v2791_v56 }
  0xe2   :  { %2324 = vmatmul.mubr.msk.bf16.gmra.mrb[16].mxu0 %vm925_vm0, %v176_v42 }
  0xe3   :  { %1371 = vmatprep.mubr.bf16.mxu0 %v2791_v56 }
  0xea   :  { %2325 = vmatmul.mubr.msk.bf16.gmra.mrb[20].mxu0 %vm925_vm0, %v183_v47 }
  0xeb   :  { %1381 = vmatprep.mubr.bf16.mxu0 %v2791_v56 }
  0xf1   :  { %v315_v36 = vpop.permute.xlu0 %314 }
  0xf2   :  { %2326 = vmatmul.mubr.msk.bf16.gmra.mrb[24].mxu0 %vm925_vm0, %v190_v52  ;;  %v403_v38 = vmul.f32 %v3679_v35, %v315_v36  ;;  %v404_v39 = vmul.f32 %v3682_v37, %v315_v36 }
  0xf3   :  { %1391 = vmatprep.mubr.bf16.mxu0 %v2791_v56  ;;  %v2699_v56 = vld [vmem:[%s3915_s3 + $0xe4] ss:$8 sps:$4 sm:$0xff]  }
  0xf4   :  { %1788 = vmatprep.subr.bf16.mxu1 %v2699_v56 }
  0xf5   :  { %1789 = vmatpush1.bf16.msra.mxu1 %v2697_v59  ;;  %v320_v40 = vpop.permute.xlu0 %319 }
  0xf6   :  { %1790 = vmatprep.subr.bf16.mxu1 %v2702_v60  ;;  %v405_v43 = vmul.f32 %v3679_v35, %v320_v40  ;;  %v325_v44 = vpop.permute.xlu1 %324  ;;  %v406_v45 = vmul.f32 %v3682_v37, %v320_v40 }
  0xf7   :  { %v407_v50 = vmul.f32 %v3679_v35, %v325_v44 }
  0xf9   :  { %1791 = vmatpush1.bf16.msra.mxu1 %v2700_v61  ;;  %v408_v61 = vmul.f32 %v3682_v37, %v325_v44 }
  0xfa   :  { %2327 = vmatmul.mubr.msk.bf16.gmra.mrb[28].mxu0 %vm925_vm0, %v197_v55 }
  0xfc   :  { %v330_v58 = vpop.permute.xlu1 %329 }
  0xfd   :  { %v410_v31 = vmul.f32 %v3682_v37, %v330_v58 }
 0x11b   :  { %v984_v62 = vpop.f32.mrb[0].mxu1 }
 0x11c   :  { %v986_v63 = vpop.f32.mrb[1].mxu1  ;;  %v985_v42 = vadd.f32 %v984_v62, %v403_v38  ;;  %v409_v62 = vmul.f32 %v3679_v35, %v330_v58  ;;  %v340_v58 = vpop.permute.xlu1 %339 }
 0x11d   :  { %v988_v0 = vpop.f32.mrb[2].mxu1  ;;  %v987_v47 = vadd.f32 %v986_v63, %v404_v39 }
 0x11e   :  { %v990_v1 = vpop.f32.mrb[3].mxu1  ;;  %v989_v53 = vadd.f32 %v988_v0, %v405_v43 }
 0x11f   :  { %v991_v54 = vadd.f32 %v990_v1, %v406_v45 }
 0x123   :  { %v3615_v2 = vpop.f32.mrb[4].mxu1 }
 0x124   :  { %v3617_v3 = vpop.f32.mrb[5].mxu1  ;;  %v995_v1 = vadd.f32 %v3615_v2, %v407_v50  ;;  %v335_v50 = vpop.permute.xlu0 %334 }
 0x125   :  { %v3619_v4 = vpop.f32.mrb[6].mxu1 }
 0x126   :  { %v3621_v5 = vpop.f32.mrb[7].mxu1  ;;  %v999_v43 = vadd.f32 %v3619_v4, %v409_v62 }
 0x127   :  { %v1001_v2 = vadd.f32 %v3621_v5, %v410_v31 }
 0x12b   :  { %v3623_v6 = vpop.f32.mrb[8].mxu1 }
 0x12c   :  { %v3625_v7 = vpop.f32.mrb[9].mxu1 }
 0x12d   :  { %v3627_v8 = vpop.f32.mrb[10].mxu1 }
 0x12e   :  { %v3629_v9 = vpop.f32.mrb[11].mxu1 }
 0x144   :  { %v3631_v10 = vpop.f32.mrb[12].mxu1 }
 0x145   :  { %v3633_v11 = vpop.f32.mrb[13].mxu1 }
 0x146   :  { %v3635_v12 = vpop.f32.mrb[14].mxu1 }
 0x147   :  { %v3637_v13 = vpop.f32.mrb[15].mxu1 }
 0x14c   :  { %v3639_v14 = vpop.f32.mrb[16].mxu1 }
 0x14d   :  { %v3641_v15 = vpop.f32.mrb[17].mxu1 }
 0x14e   :  { %v3643_v16 = vpop.f32.mrb[18].mxu1 }
 0x14f   :  { %v3645_v17 = vpop.f32.mrb[19].mxu1 }
 0x154   :  { %v3647_v18 = vpop.f32.mrb[20].mxu1 }
 0x155   :  { %v3649_v19 = vpop.f32.mrb[21].mxu1 }
 0x156   :  { %v3651_v20 = vpop.f32.mrb[22].mxu1 }
 0x157   :  { %v3653_v21 = vpop.f32.mrb[23].mxu1 }
 0x15c   :  { %v3655_v22 = vpop.f32.mrb[24].mxu1 }
 0x15d   :  { %v3657_v23 = vpop.f32.mrb[25].mxu1 }
 0x15e   :  { %v3659_v24 = vpop.f32.mrb[26].mxu1 }
 0x15f   :  { %v3661_v25 = vpop.f32.mrb[27].mxu1 }
 0x164   :  { %v3663_v26 = vpop.f32.mrb[28].mxu1 }
 0x165   :  { %v3665_v27 = vpop.f32.mrb[29].mxu1 }
 0x166   :  { %v3667_v28 = vpop.f32.mrb[30].mxu1 }
 0x167   :  { %v3669_v29 = vpop.f32.mrb[31].mxu1 }
 0x195   :  { %v1323_v48 = vpop.f32.mrb[0].mxu0 }
 0x196   :  { %v2377_v51 = vadd.f32 %v1323_v48, %v985_v42  ;;  %v1325_v52 = vpop.f32.mrb[1].mxu0  ;;  %v997_v42 = vadd.f32 %v3617_v3, %v408_v61  ;;  %v413_v61 = vmul.f32 %v3679_v35, %v340_v58 }
 0x197   :  { %v2379_v55 = vadd.f32 %v1325_v52, %v987_v47  ;;  %v1327_v57 = vpop.f32.mrb[2].mxu0 }
 0x198   :  { %v1413_v56 = vadd.f32 %v2377_v51, %v3692_v46  ;;  %v2381_v59 = vadd.f32 %v1327_v57, %v989_v53  ;;  %v1329_v60 = vpop.f32.mrb[3].mxu0  ;;  %v411_v57 = vmul.f32 %v3679_v35, %v335_v50 }
 0x199   :  { %v1414_v63 = vadd.f32 %v2379_v55, %v3695_v49  ;;  %v2383_v30 = vadd.f32 %v1329_v60, %v991_v54  ;;  %v412_v60 = vmul.f32 %v3682_v37, %v335_v50 }
 0x19a   :  { %v1477_v33 = vmul.f32 0.2, %v1413_v56  ;;  %v1415_v0 = vadd.f32 %v2381_v59, %v3692_v46  ;;  %vm1445_vm1 = vcmp.gt.f32.partialorder %v1413_v56, 0.0 }
 0x19b   :  { %v1478_v36 = vmul.f32 0.2, %v1414_v63  ;;  %v1416_v38 = vadd.f32 %v2383_v30, %v3695_v49  ;;  %vm1446_vm2 = vcmp.gt.f32.partialorder %v1414_v63, 0.0  ;;  %v414_v30 = vmul.f32 %v3682_v37, %v340_v58 }
 0x19c   :  { %vm1447_vm3 = vcmp.gt.f32.partialorder %v1415_v0, 0.0  ;;  %v1479_v39 = vmul.f32 0.2, %v1415_v0  ;;  %v1509_v44 = vsel %vm1445_vm1, %v1413_v56, %v1477_v33 }
 0x19d   :  { %vm1448_vm4 = vcmp.gt.f32.partialorder %v1416_v38, 0.0  ;;  %v1480_v40 = vmul.f32 0.2, %v1416_v38  ;;  %v1333_v41 = vpop.f32.mrb[4].mxu0  ;;  %v1510_v54 = vsel %vm1446_vm2, %v1414_v63, %v1478_v36 }
 0x19e   :  { %v1511_v45 = vsel %vm1447_vm3, %v1415_v0, %v1479_v39  ;;  %v2385_v47 = vadd.f32 %v1333_v41, %v995_v1  ;;  %v1335_v48 = vpop.f32.mrb[5].mxu0  ;;  %v1005_v1 = vadd.f32 %v3623_v6, %v411_v57  ;;  %v1009_v41 = vadd.f32 %v3627_v8, %v413_v61 }
 0x19f   :  { %v1541_v51 = vpack.c.bf16 %v1511_v45, %v1509_v44  ;;  %v2387_v52 = vadd.f32 %v1335_v48, %v997_v42  ;;  %v1337_v53 = vpop.f32.mrb[6].mxu0  ;;  %v1512_v55 = vsel %vm1448_vm4, %v1416_v38, %v1480_v40  ;;  %v1007_v38 = vadd.f32 %v3625_v7, %v412_v60  ;;  %v345_v48 = vpop.permute.xlu0 %344 }
 0x1a0   :  { %v1417_v3 = vadd.f32 %v2385_v47, %v3692_v46  ;;  %v2389_v59 = vadd.f32 %v1337_v53, %v999_v43  ;;  %v1339_v4 = vpop.f32.mrb[7].mxu0  ;;  %v1542_v56 = vpack.c.bf16 %v1512_v55, %v1510_v54  ;;  %v1011_v44 = vadd.f32 %v3629_v9, %v414_v30  ;;  %v350_v53 = vpop.permute.xlu1 %349 }
 0x1a1   :  { %v1418_v5 = vadd.f32 %v2387_v52, %v3695_v49  ;;  %v2391_v62 = vadd.f32 %v1339_v4, %v1001_v2  ;;  %v415_v7 = vmul.f32 %v3679_v35, %v345_v48  ;;  %v416_v9 = vmul.f32 %v3682_v37, %v345_v48 }
 0x1a2   :  { %v1481_v31 = vmul.f32 0.2, %v1417_v3  ;;  %v1419_v63 = vadd.f32 %v2389_v59, %v3692_v46  ;;  %1792 = vmatprep.mubr.bf16.mxu1 %v1542_v56  ;;  %vm1449_vm5 = vcmp.gt.f32.partialorder %v1417_v3, 0.0  ;;  %v417_v58 = vmul.f32 %v3679_v35, %v350_v53 }
 0x1a3   :  { %v1482_v33 = vmul.f32 0.2, %v1418_v5  ;;  %v1420_v0 = vadd.f32 %v2391_v62, %v3695_v49  ;;  %1793 = vmatmul.mubr.bf16.vlgmr.msra.gmra.mrb[32].mxu1 %v1541_v51  ;;  %vm1450_vm6 = vcmp.gt.f32.partialorder %v1418_v5, 0.0  ;;  %v418_v4 = vmul.f32 %v3682_v37, %v350_v53 }
 0x1a4   :  { %vm1451_vm7 = vcmp.gt.f32.partialorder %v1419_v63, 0.0  ;;  %v1483_v36 = vmul.f32 0.2, %v1419_v63  ;;  %v1513_v45 = vsel %vm1449_vm5, %v1417_v3, %v1481_v31  ;;  %v1015_v62 = vadd.f32 %v3631_v10, %v415_v7 }
 0x1a5   :  { %vm1452_vm8 = vcmp.gt.f32.partialorder %v1420_v0, 0.0  ;;  %v1484_v39 = vmul.f32 0.2, %v1420_v0  ;;  %v1343_v40 = vpop.f32.mrb[8].mxu0  ;;  %v1514_v50 = vsel %vm1450_vm6, %v1418_v5, %v1482_v33  ;;  %v1017_v31 = vadd.f32 %v3633_v11, %v416_v9 }
 0x1a6   :  { %v2393_v42 = vadd.f32 %v1343_v40, %v1005_v1  ;;  %v1345_v43 = vpop.f32.mrb[9].mxu0  ;;  %v1515_v47 = vsel %vm1451_vm7, %v1419_v63, %v1483_v36 }
 0x1a7   :  { %v2395_v2 = vadd.f32 %v1345_v43, %v1007_v38  ;;  %v1347_v6 = vpop.f32.mrb[10].mxu0  ;;  %v1516_v51 = vsel %vm1452_vm8, %v1420_v0, %v1484_v39  ;;  %v1543_v52 = vpack.c.bf16 %v1515_v47, %v1513_v45  ;;  %v1019_v0 = vadd.f32 %v3635_v12, %v417_v58  ;;  %v360_v47 = vpop.permute.xlu1 %359 }
 0x1a8   :  { %v1421_v54 = vadd.f32 %v2393_v42, %v3692_v46  ;;  %v2397_v8 = vadd.f32 %v1347_v6, %v1009_v41  ;;  %v1349_v55 = vpop.f32.mrb[11].mxu0  ;;  %v1544_v57 = vpack.c.bf16 %v1516_v51, %v1514_v50  ;;  %v1021_v38 = vadd.f32 %v3637_v13, %v418_v4  ;;  %v355_v41 = vpop.permute.xlu0 %354 }
 0x1a9   :  { %v1422_v3 = vadd.f32 %v2395_v2, %v3695_v49  ;;  %v2399_v59 = vadd.f32 %v1349_v55, %v1011_v44  ;;  %v419_v11 = vmul.f32 %v3679_v35, %v355_v41  ;;  %v420_v13 = vmul.f32 %v3682_v37, %v355_v41 }
 0x1aa   :  { %v1485_v56 = vmul.f32 0.2, %v1421_v54  ;;  %v1423_v60 = vadd.f32 %v2397_v8, %v3692_v46  ;;  %1802 = vmatprep.mubr.bf16.mxu1 %v1544_v57  ;;  %vm1453_vm9 = vcmp.gt.f32.partialorder %v1421_v54, 0.0  ;;  %v421_v50 = vmul.f32 %v3679_v35, %v360_v47 }
 0x1ab   :  { %v1486_v61 = vmul.f32 0.2, %v1422_v3  ;;  %v1424_v5 = vadd.f32 %v2399_v59, %v3695_v49  ;;  %1803 = vmatmul.mubr.bf16.gmra.mrb[36].mxu1 %v1543_v52  ;;  %vm1454_vm10 = vcmp.gt.f32.partialorder %v1422_v3, 0.0  ;;  %v422_v7 = vmul.f32 %v3682_v37, %v360_v47 }
 0x1ac   :  { %vm1455_vm11 = vcmp.gt.f32.partialorder %v1423_v60, 0.0  ;;  %v1487_v30 = vmul.f32 0.2, %v1423_v60  ;;  %v1517_v39 = vsel %vm1453_vm9, %v1421_v54, %v1485_v56  ;;  %v1025_v57 = vadd.f32 %v3639_v14, %v419_v11 }
 0x1ad   :  { %vm1456_vm12 = vcmp.gt.f32.partialorder %v1424_v5, 0.0  ;;  %v1488_v63 = vmul.f32 0.2, %v1424_v5  ;;  %v1353_v33 = vpop.f32.mrb[12].mxu0  ;;  %v1518_v43 = vsel %vm1454_vm10, %v1422_v3, %v1486_v61  ;;  %v1027_v58 = vadd.f32 %v3641_v15, %v420_v13 }
 0x1ae   :  { %v2401_v1 = vadd.f32 %v1353_v33, %v1015_v62  ;;  %v1355_v36 = vpop.f32.mrb[13].mxu0  ;;  %v1519_v40 = vsel %vm1455_vm11, %v1423_v60, %v1487_v30  ;;  %v1029_v4 = vadd.f32 %v3643_v16, %v421_v50  ;;  %v1031_v61 = vadd.f32 %v3645_v17, %v422_v7  ;;  %v365_v30 = vpop.permute.xlu0 %364 }
 0x1af   :  { %v2403_v42 = vadd.f32 %v1355_v36, %v1017_v31  ;;  %v1357_v10 = vpop.f32.mrb[14].mxu0  ;;  %v1520_v44 = vsel %vm1456_vm12, %v1424_v5, %v1488_v63  ;;  %v1545_v45 = vpack.c.bf16 %v1519_v40, %v1517_v39  ;;  %v423_v15 = vmul.f32 %v3679_v35, %v365_v30 }
 0x1b0   :  { %v1425_v48 = vadd.f32 %v2401_v1, %v3692_v46  ;;  %v2405_v12 = vadd.f32 %v1357_v10, %v1019_v0  ;;  %v1359_v2 = vpop.f32.mrb[15].mxu0  ;;  %v1546_v6 = vpack.c.bf16 %v1520_v44, %v1518_v43  ;;  %v370_v1 = vpop.permute.xlu1 %369  ;;  %v424_v17 = vmul.f32 %v3682_v37, %v365_v30 }
 0x1b1   :  { %v1426_v51 = vadd.f32 %v2403_v42, %v3695_v49  ;;  %v2407_v52 = vadd.f32 %v1359_v2, %v1021_v38  ;;  %v425_v40 = vmul.f32 %v3679_v35, %v370_v1  ;;  %v426_v10 = vmul.f32 %v3682_v37, %v370_v1 }
 0x1b2   :  { %v1489_v53 = vmul.f32 0.2, %v1425_v48  ;;  %v1427_v54 = vadd.f32 %v2405_v12, %v3692_v46  ;;  %1812 = vmatprep.mubr.bf16.mxu1 %v1546_v6  ;;  %vm1457_vm13 = vcmp.gt.f32.partialorder %v1425_v48, 0.0  ;;  %v1035_v47 = vadd.f32 %v3647_v18, %v423_v15 }
 0x1b3   :  { %v1490_v8 = vmul.f32 0.2, %v1426_v51  ;;  %v1428_v55 = vadd.f32 %v2407_v52, %v3695_v49  ;;  %1813 = vmatmul.mubr.bf16.gmra.mrb[40].mxu1 %v1545_v45  ;;  %vm1458_vm14 = vcmp.gt.f32.partialorder %v1426_v51, 0.0  ;;  %v1037_v12 = vadd.f32 %v3649_v19, %v424_v17 }
 0x1b4   :  { %vm1459_vm15 = vcmp.gt.f32.partialorder %v1427_v54, 0.0  ;;  %v1491_v9 = vmul.f32 0.2, %v1427_v54  ;;  %v1521_v5 = vsel %vm1457_vm13, %v1425_v48, %v1489_v53  ;;  %v1039_v13 = vadd.f32 %v3651_v20, %v425_v40 }
 0x1b5   :  { %vm1460_vm0 = vcmp.gt.f32.partialorder %v1428_v55, 0.0  ;;  %v1492_v3 = vmul.f32 0.2, %v1428_v55  ;;  %v1363_v59 = vpop.f32.mrb[16].mxu0  ;;  %v1522_v63 = vsel %vm1458_vm14, %v1426_v51, %v1490_v8  ;;  %v1041_v52 = vadd.f32 %v3653_v21, %v426_v10 }
 0x1b6   :  { %v2409_v56 = vadd.f32 %v1363_v59, %v1025_v57  ;;  %v1365_v60 = vpop.f32.mrb[17].mxu0  ;;  %v1523_v62 = vsel %vm1459_vm15, %v1427_v54, %v1491_v9  ;;  %v375_v54 = vpop.permute.xlu0 %374 }
 0x1b7   :  { %v2411_v31 = vadd.f32 %v1365_v60, %v1027_v58  ;;  %v1367_v14 = vpop.f32.mrb[18].mxu0  ;;  %v1524_v33 = vsel %vm1460_vm0, %v1428_v55, %v1492_v3  ;;  %v1547_v0 = vpack.c.bf16 %v1523_v62, %v1521_v5  ;;  %v427_v19 = vmul.f32 %v3679_v35, %v375_v54  ;;  %v380_v58 = vpop.permute.xlu1 %379 }
 0x1b8   :  { %v1429_v36 = vadd.f32 %v2409_v56, %v3692_v46  ;;  %v2413_v16 = vadd.f32 %v1367_v14, %v1029_v4  ;;  %v1369_v38 = vpop.f32.mrb[19].mxu0  ;;  %v1548_v39 = vpack.c.bf16 %v1524_v33, %v1522_v63  ;;  %v428_v21 = vmul.f32 %v3682_v37, %v375_v54 }
 0x1b9   :  { %v1430_v41 = vadd.f32 %v2411_v31, %v3695_v49  ;;  %v2415_v42 = vadd.f32 %v1369_v38, %v1031_v61  ;;  %v429_v56 = vmul.f32 %v3679_v35, %v380_v58  ;;  %v430_v5 = vmul.f32 %v3682_v37, %v380_v58 }
 0x1ba   :  { %v1493_v43 = vmul.f32 0.2, %v1429_v36  ;;  %v1431_v44 = vadd.f32 %v2413_v16, %v3692_v46  ;;  %1822 = vmatprep.mubr.bf16.mxu1 %v1548_v39  ;;  %vm1461_vm1 = vcmp.gt.f32.partialorder %v1429_v36, 0.0  ;;  %v1045_v63 = vadd.f32 %v3655_v22, %v427_v19  ;;  %v385_v15 = vpop.permute.xlu0 %384 }
 0x1bb   :  { %v1494_v45 = vmul.f32 0.2, %v1430_v41  ;;  %v1432_v11 = vadd.f32 %v2415_v42, %v3695_v49  ;;  %1823 = vmatmul.mubr.bf16.gmra.mrb[44].mxu1 %v1547_v0  ;;  %vm1462_vm2 = vcmp.gt.f32.partialorder %v1430_v41, 0.0  ;;  %v1047_v0 = vadd.f32 %v3657_v23, %v428_v21  ;;  %v390_v38 = vpop.permute.xlu1 %389 }
 0x1bc   :  { %vm1463_vm3 = vcmp.gt.f32.partialorder %v1431_v44, 0.0  ;;  %v1495_v48 = vmul.f32 0.2, %v1431_v44  ;;  %v1525_v7 = vsel %vm1461_vm1, %v1429_v36, %v1493_v43  ;;  %v1049_v16 = vadd.f32 %v3659_v24, %v429_v56 }
 0x1bd   :  { %vm1464_vm4 = vcmp.gt.f32.partialorder %v1432_v11, 0.0  ;;  %v1496_v2 = vmul.f32 0.2, %v1432_v11  ;;  %v1373_v6 = vpop.f32.mrb[20].mxu0  ;;  %v1526_v55 = vsel %vm1462_vm2, %v1430_v41, %v1494_v45  ;;  %v1051_v40 = vadd.f32 %v3661_v25, %v430_v5 }
 0x1be   :  { %v2417_v50 = vadd.f32 %v1373_v6, %v1035_v47  ;;  %v1375_v51 = vpop.f32.mrb[21].mxu0  ;;  %v1527_v53 = vsel %vm1463_vm3, %v1431_v44, %v1495_v48  ;;  %v431_v45 = vmul.f32 %v3679_v35, %v385_v15  ;;  %v433_v25 = vmul.f32 %v3679_v35, %v390_v38 }
 0x1bf   :  { %v2419_v8 = vadd.f32 %v1375_v51, %v1037_v12  ;;  %v1377_v18 = vpop.f32.mrb[22].mxu0  ;;  %v1528_v57 = vsel %vm1464_vm4, %v1432_v11, %v1496_v2  ;;  %v1549_v9 = vpack.c.bf16 %v1527_v53, %v1525_v7  ;;  %v432_v12 = vmul.f32 %v3682_v37, %v385_v15 }
 0x1c0   :  { %v1433_v3 = vadd.f32 %v2417_v50, %v3692_v46  ;;  %v2421_v20 = vadd.f32 %v1377_v18, %v1039_v13  ;;  %v1379_v59 = vpop.f32.mrb[23].mxu0  ;;  %v1550_v4 = vpack.c.bf16 %v1528_v57, %v1526_v55  ;;  %v434_v13 = vmul.f32 %v3682_v37, %v390_v38  ;;  %v2221_v38 = vld [vmem:[%s3916_s4 + $0x3] ss:$8 sm:$0x3] }
 0x1c1   :  { %v1434_v60 = vadd.f32 %v2419_v8, %v3695_v49  ;;  %v2423_v61 = vadd.f32 %v1379_v59, %v1041_v52  ;;  %v1055_v53 = vadd.f32 %v3663_v26, %v431_v45  ;;  %v1057_v35 = vadd.f32 %v3665_v27, %v432_v12 }
 0x1c2   :  { %v1497_v62 = vmul.f32 0.2, %v1433_v3  ;;  %v1435_v30 = vadd.f32 %v2421_v20, %v3692_v46  ;;  %1832 = vmatprep.mubr.bf16.mxu1 %v1550_v4  ;;  %vm1465_vm5 = vcmp.gt.f32.partialorder %v1433_v3, 0.0  ;;  %v1059_v8 = vadd.f32 %v3667_v28, %v433_v25 }
 0x1c3   :  { %v1498_v31 = vmul.f32 0.2, %v1434_v60  ;;  %v1436_v14 = vadd.f32 %v2423_v61, %v3695_v49  ;;  %1833 = vmatmul.mubr.bf16.gmra.mrb[48].mxu1 %v1549_v9  ;;  %vm1466_vm6 = vcmp.gt.f32.partialorder %v1434_v60, 0.0  ;;  %v1061_v55 = vadd.f32 %v3669_v29, %v434_v13 }
 0x1c4   :  { %vm1467_vm7 = vcmp.gt.f32.partialorder %v1435_v30, 0.0  ;;  %v1499_v33 = vmul.f32 0.2, %v1435_v30  ;;  %v1529_v41 = vsel %vm1465_vm5, %v1433_v3, %v1497_v62 }
 0x1c5   :  { %vm1468_vm8 = vcmp.gt.f32.partialorder %v1436_v14, 0.0  ;;  %v1500_v1 = vmul.f32 0.2, %v1436_v14  ;;  %v1383_v36 = vpop.f32.mrb[24].mxu0  ;;  %v1530_v43 = vsel %vm1466_vm6, %v1434_v60, %v1498_v31 }
 0x1c6   :  { %v2425_v39 = vadd.f32 %v1383_v36, %v1045_v63  ;;  %v1385_v17 = vpop.f32.mrb[25].mxu0  ;;  %v1531_v42 = vsel %vm1467_vm7, %v1435_v30, %v1499_v33 }
 0x1c7   :  { %v2427_v22 = vadd.f32 %v1385_v17, %v1047_v0  ;;  %v1387_v10 = vpop.f32.mrb[26].mxu0  ;;  %v1532_v44 = vsel %vm1468_vm8, %v1436_v14, %v1500_v1  ;;  %v1551_v23 = vpack.c.bf16 %v1531_v42, %v1529_v41 }
 0x1c8   :  { %v1437_v11 = vadd.f32 %v2425_v39, %v3692_v46  ;;  %v2429_v47 = vadd.f32 %v1387_v10, %v1049_v16  ;;  %v1389_v24 = vpop.f32.mrb[27].mxu0  ;;  %v1552_v48 = vpack.c.bf16 %v1532_v44, %v1530_v43 }
 0x1c9   :  { %v1438_v2 = vadd.f32 %v2427_v22, %v3695_v49  ;;  %v2431_v6 = vadd.f32 %v1389_v24, %v1051_v40  ;;  %v3812_v22 = vrot.slane %v2221_v38, %v3671_v32 }
 0x1ca   :  { %v1501_v50 = vmul.f32 0.2, %v1437_v11  ;;  %v1439_v51 = vadd.f32 %v2429_v47, %v3692_v46  ;;  %1842 = vmatprep.mubr.bf16.mxu1 %v1552_v48  ;;  %vm1469_vm9 = vcmp.gt.f32.partialorder %v1437_v11, 0.0 }
 0x1cb   :  { %v1502_v52 = vmul.f32 0.2, %v1438_v2  ;;  %v1440_v7 = vadd.f32 %v2431_v6, %v3695_v49  ;;  %1843 = vmatmul.mubr.bf16.gmra.mrb[52].mxu1 %v1551_v23  ;;  %vm1470_vm10 = vcmp.gt.f32.partialorder %v1438_v2, 0.0  ;;  %v3816_v23 = vrot.slane %v2221_v38, %v3676_v34 }
 0x1cc   :  { %vm1471_vm11 = vcmp.gt.f32.partialorder %v1439_v51, 0.0  ;;  %v1503_v54 = vmul.f32 0.2, %v1439_v51  ;;  %v1533_v19 = vsel %vm1469_vm9, %v1437_v11, %v1501_v50 }
 0x1cd   :  { %vm1472_vm12 = vcmp.gt.f32.partialorder %v1440_v7, 0.0  ;;  %v1504_v37 = vmul.f32 0.2, %v1440_v7  ;;  %v1393_v18 = vpop.f32.mrb[28].mxu0  ;;  %v1534_v26 = vsel %vm1470_vm10, %v1438_v2, %v1502_v52 }
 0x1ce   :  { %v2433_v57 = vadd.f32 %v1393_v18, %v1055_v53  ;;  %v1395_v9 = vpop.f32.mrb[29].mxu0  ;;  %v1535_v58 = vsel %vm1471_vm11, %v1439_v51, %v1503_v54 }
 0x1cf   :  { %v2435_v3 = vadd.f32 %v1395_v9, %v1057_v35  ;;  %v1397_v20 = vpop.f32.mrb[30].mxu0  ;;  %v1536_v59 = vsel %vm1472_vm12, %v1440_v7, %v1504_v37  ;;  %v1553_v4 = vpack.c.bf16 %v1535_v58, %v1533_v19 }
 0x1d0   :  { %v1441_v21 = vadd.f32 %v2433_v57, %v3692_v46  ;;  %v2437_v27 = vadd.f32 %v1397_v20, %v1059_v8  ;;  %v1399_v56 = vpop.f32.mrb[31].mxu0  ;;  %v1554_v28 = vpack.c.bf16 %v1536_v59, %v1534_v26 }
 0x1d1   :  { %v1442_v60 = vadd.f32 %v2435_v3, %v3695_v49  ;;  %v2439_v61 = vadd.f32 %v1399_v56, %v1061_v55 }
 0x1d2   :  { %v1505_v5 = vmul.f32 0.2, %v1441_v21  ;;  %v1443_v29 = vadd.f32 %v2437_v27, %v3692_v46  ;;  %1852 = vmatprep.mubr.bf16.mxu1 %v1554_v28  ;;  %vm1473_vm13 = vcmp.gt.f32.partialorder %v1441_v21, 0.0  ;;  %v2220_v46 = vld [vmem:[%s3916_s4 + $0x2] ss:$8 sm:$0x3] }
 0x1d3   :  { %v1506_v62 = vmul.f32 0.2, %v1442_v60  ;;  %v1444_v30 = vadd.f32 %v2439_v61, %v3695_v49  ;;  %1853 = vmatmul.mubr.bf16.gmra.mrb[56].mxu1 %v1553_v4  ;;  %vm1474_vm14 = vcmp.gt.f32.partialorder %v1442_v60, 0.0  ;;  %v3801_v49 = vrot.slane %v2220_v46, %v3671_v32 }
 0x1d4   :  { %vm1475_vm15 = vcmp.gt.f32.partialorder %v1443_v29, 0.0  ;;  %v1507_v31 = vmul.f32 0.2, %v1443_v29  ;;  %v1537_v63 = vsel %vm1473_vm13, %v1441_v21, %v1505_v5  ;;  %v3804_v16 = vrot.slane %v2220_v46, %v3676_v34 }
 0x1d5   :  { %vm1476_vm0 = vcmp.gt.f32.partialorder %v1444_v30, 0.0  ;;  %v1508_v14 = vmul.f32 0.2, %v1444_v30  ;;  %v1538_v0 = vsel %vm1474_vm14, %v1442_v60, %v1506_v62 }
 0x1d6   :  { %v1539_v33 = vsel %vm1475_vm15, %v1443_v29, %v1507_v31 }
 0x1d7   :  { %v1540_v15 = vsel %vm1476_vm0, %v1444_v30, %v1508_v14  ;;  %v1555_v1 = vpack.c.bf16 %v1539_v33, %v1537_v63 }
 0x1d8   :  { %v1556_v36 = vpack.c.bf16 %v1540_v15, %v1538_v0 }
 0x1da   :  { %1862 = vmatprep.mubr.bf16.mxu1 %v1556_v36 }
 0x1db   :  { %1863 = vmatmul.mubr.bf16.gmra.mrb[60].mxu1 %v1555_v1 }
 0x276   :  { %v1794_v39 = vpop.f32.mrb[32].mxu1 }
 0x277   :  { %v1795_v17 = vadd.f32 %v1794_v39, %v3801_v49  ;;  %v1796_v40 = vpop.f32.mrb[33].mxu1 }
 0x278   :  { %v1797_v41 = vadd.f32 %v1796_v40, %v3804_v16  ;;  %v1798_v42 = vpop.f32.mrb[34].mxu1 }
 0x279   :  { %vm1873_vm1 = vcmp.gt.f32.partialorder %v1795_v17, 0.0  ;;  %v1905_v10 = vmul.f32 0.2, %v1795_v17  ;;  %v1799_v43 = vadd.f32 %v1798_v42, %v3801_v49  ;;  %v1800_v44 = vpop.f32.mrb[35].mxu1 }
 0x27a   :  { %vm1874_vm2 = vcmp.gt.f32.partialorder %v1797_v41, 0.0  ;;  %v1906_v45 = vmul.f32 0.2, %v1797_v41  ;;  %v1801_v11 = vadd.f32 %v1800_v44, %v3804_v16 }
 0x27b   :  { %vm1875_vm3 = vcmp.gt.f32.partialorder %v1799_v43, 0.0  ;;  %v1907_v47 = vmul.f32 0.2, %v1799_v43  ;;  %v1937_v24 = vsel %vm1873_vm1, %v1795_v17, %v1905_v10 }
 0x27c   :  { %vm1876_vm4 = vcmp.gt.f32.partialorder %v1801_v11, 0.0  ;;  %v1908_v48 = vmul.f32 0.2, %v1801_v11  ;;  %v1938_v12 = vsel %vm1874_vm2, %v1797_v41, %v1906_v45  ;;  %v1980_v32 = vmul.f32 %v3812_v22, %v1937_v24 }
 0x27d   :  { %v1981_v25 = vmul.f32 %v3816_v23, %v1938_v12  ;;  %v1939_v2 = vsel %vm1875_vm3, %v1799_v43, %v1907_v47 }
 0x27e   :  { %v1804_v6 = vpop.f32.mrb[36].mxu1  ;;  %v1940_v13 = vsel %vm1876_vm4, %v1801_v11, %v1908_v48  ;;  %v1982_v34 = vmul.f32 %v3812_v22, %v1939_v2 }
 0x27f   :  { %v1805_v50 = vadd.f32 %v1804_v6, %v3801_v49  ;;  %v1806_v51 = vpop.f32.mrb[37].mxu1  ;;  %v2012_v52 = vadd.f32 %v1981_v25, %v1980_v32  ;;  %v1983_v7 = vmul.f32 %v3816_v23, %v1940_v13 }
 0x280   :  { %v1807_v53 = vadd.f32 %v1806_v51, %v3804_v16  ;;  %v1808_v54 = vpop.f32.mrb[38].mxu1 }
 0x281   :  { %vm1877_vm5 = vcmp.gt.f32.partialorder %v1805_v50, 0.0  ;;  %v1909_v35 = vmul.f32 0.2, %v1805_v50  ;;  %v1809_v8 = vadd.f32 %v1808_v54, %v3801_v49  ;;  %v1810_v37 = vpop.f32.mrb[39].mxu1  ;;  %2013 = vadd.xlane.f32.xlu0 %v2012_v52  ;;  %v2015_v18 = vadd.f32 %v1983_v7, %v1982_v34 }
 0x282   :  { %vm1878_vm6 = vcmp.gt.f32.partialorder %v1807_v53, 0.0  ;;  %v1910_v55 = vmul.f32 0.2, %v1807_v53  ;;  %v1811_v57 = vadd.f32 %v1810_v37, %v3804_v16 }
 0x283   :  { %vm1879_vm7 = vcmp.gt.f32.partialorder %v1809_v8, 0.0  ;;  %v1911_v9 = vmul.f32 0.2, %v1809_v8  ;;  %2016 = vadd.xlane.f32.xlu1 %v2015_v18  ;;  %v1941_v19 = vsel %vm1877_vm5, %v1805_v50, %v1909_v35 }
 0x284   :  { %vm1880_vm8 = vcmp.gt.f32.partialorder %v1811_v57, 0.0  ;;  %v1912_v58 = vmul.f32 0.2, %v1811_v57  ;;  %v1942_v3 = vsel %vm1878_vm6, %v1807_v53, %v1910_v55  ;;  %v1984_v20 = vmul.f32 %v3812_v22, %v1941_v19 }
 0x285   :  { %v1985_v26 = vmul.f32 %v3816_v23, %v1942_v3  ;;  %v1943_v59 = vsel %vm1879_vm7, %v1809_v8, %v1911_v9 }
 0x286   :  { %v1814_v4 = vpop.f32.mrb[40].mxu1  ;;  %v1944_v21 = vsel %vm1880_vm8, %v1811_v57, %v1912_v58  ;;  %v1986_v27 = vmul.f32 %v3812_v22, %v1943_v59 }
 0x287   :  { %v1815_v56 = vadd.f32 %v1814_v4, %v3801_v49  ;;  %v1816_v28 = vpop.f32.mrb[41].mxu1  ;;  %v2018_v60 = vadd.f32 %v1985_v26, %v1984_v20  ;;  %v1987_v61 = vmul.f32 %v3816_v23, %v1944_v21 }
 0x288   :  { %v1817_v5 = vadd.f32 %v1816_v28, %v3804_v16  ;;  %v1818_v29 = vpop.f32.mrb[42].mxu1 }
 0x289   :  { %vm1881_vm9 = vcmp.gt.f32.partialorder %v1815_v56, 0.0  ;;  %v1913_v62 = vmul.f32 0.2, %v1815_v56  ;;  %v1819_v30 = vadd.f32 %v1818_v29, %v3801_v49  ;;  %v1820_v31 = vpop.f32.mrb[43].mxu1  ;;  %2019 = vadd.xlane.f32.xlu0 %v2018_v60  ;;  %v2021_v14 = vadd.f32 %v1987_v61, %v1986_v27 }
 0x28a   :  { %vm1882_vm10 = vcmp.gt.f32.partialorder %v1817_v5, 0.0  ;;  %v1914_v63 = vmul.f32 0.2, %v1817_v5  ;;  %v1821_v33 = vadd.f32 %v1820_v31, %v3804_v16 }
 0x28b   :  { %vm1883_vm11 = vcmp.gt.f32.partialorder %v1819_v30, 0.0  ;;  %v1915_v0 = vmul.f32 0.2, %v1819_v30  ;;  %v1945_v15 = vsel %vm1881_vm9, %v1815_v56, %v1913_v62 }
 0x28c   :  { %vm1884_vm12 = vcmp.gt.f32.partialorder %v1821_v33, 0.0  ;;  %v1916_v1 = vmul.f32 0.2, %v1821_v33  ;;  %v1946_v36 = vsel %vm1882_vm10, %v1817_v5, %v1914_v63  ;;  %v1988_v46 = vmul.f32 %v3812_v22, %v1945_v15 }
 0x28d   :  { %2022 = vadd.xlane.f32.xlu0 %v2021_v14  ;;  %v1989_v38 = vmul.f32 %v3816_v23, %v1946_v36  ;;  %v1947_v39 = vsel %vm1883_vm11, %v1819_v30, %v1915_v0 }
 0x28e   :  { %v1824_v17 = vpop.f32.mrb[44].mxu1  ;;  %v1948_v40 = vsel %vm1884_vm12, %v1821_v33, %v1916_v1  ;;  %v1990_v41 = vmul.f32 %v3812_v22, %v1947_v39 }
 0x28f   :  { %v1825_v42 = vadd.f32 %v1824_v17, %v3801_v49  ;;  %v1826_v10 = vpop.f32.mrb[45].mxu1  ;;  %v2024_v43 = vadd.f32 %v1989_v38, %v1988_v46  ;;  %v1991_v44 = vmul.f32 %v3816_v23, %v1948_v40 }
 0x290   :  { %v1827_v45 = vadd.f32 %v1826_v10, %v3804_v16  ;;  %v1828_v11 = vpop.f32.mrb[46].mxu1 }
 0x291   :  { %vm1885_vm13 = vcmp.gt.f32.partialorder %v1825_v42, 0.0  ;;  %v1917_v47 = vmul.f32 0.2, %v1825_v42  ;;  %v1829_v24 = vadd.f32 %v1828_v11, %v3801_v49  ;;  %v1830_v48 = vpop.f32.mrb[47].mxu1  ;;  %2025 = vadd.xlane.f32.xlu1 %v2024_v43  ;;  %v2027_v12 = vadd.f32 %v1991_v44, %v1990_v41 }
 0x292   :  { %vm1886_vm14 = vcmp.gt.f32.partialorder %v1827_v45, 0.0  ;;  %v1918_v32 = vmul.f32 0.2, %v1827_v45  ;;  %v1831_v25 = vadd.f32 %v1830_v48, %v3804_v16 }
 0x293   :  { %vm1887_vm15 = vcmp.gt.f32.partialorder %v1829_v24, 0.0  ;;  %v1919_v2 = vmul.f32 0.2, %v1829_v24  ;;  %2028 = vadd.xlane.f32.xlu0 %v2027_v12  ;;  %v1949_v6 = vsel %vm1885_vm13, %v1825_v42, %v1917_v47 }
 0x294   :  { %vm1888_vm0 = vcmp.gt.f32.partialorder %v1831_v25, 0.0  ;;  %v1920_v13 = vmul.f32 0.2, %v1831_v25  ;;  %v1950_v34 = vsel %vm1886_vm14, %v1827_v45, %v1918_v32  ;;  %v1992_v50 = vmul.f32 %v3812_v22, %v1949_v6 }
 0x295   :  { %v1993_v51 = vmul.f32 %v3816_v23, %v1950_v34  ;;  %v1951_v52 = vsel %vm1887_vm15, %v1829_v24, %v1919_v2 }
 0x296   :  { %v1834_v7 = vpop.f32.mrb[48].mxu1  ;;  %v1952_v53 = vsel %vm1888_vm0, %v1831_v25, %v1920_v13  ;;  %v1994_v54 = vmul.f32 %v3812_v22, %v1951_v52 }
 0x297   :  { %v1835_v35 = vadd.f32 %v1834_v7, %v3801_v49  ;;  %v1836_v8 = vpop.f32.mrb[49].mxu1  ;;  %v2030_v37 = vadd.f32 %v1993_v51, %v1992_v50  ;;  %v1995_v18 = vmul.f32 %v3816_v23, %v1952_v53 }
 0x298   :  { %v1837_v55 = vadd.f32 %v1836_v8, %v3804_v16  ;;  %v1838_v57 = vpop.f32.mrb[50].mxu1 }
 0x299   :  { %vm1889_vm1 = vcmp.gt.f32.partialorder %v1835_v35, 0.0  ;;  %v1921_v9 = vmul.f32 0.2, %v1835_v35  ;;  %v1839_v19 = vadd.f32 %v1838_v57, %v3801_v49  ;;  %v1840_v58 = vpop.f32.mrb[51].mxu1  ;;  %2031 = vadd.xlane.f32.xlu1 %v2030_v37  ;;  %v2033_v3 = vadd.f32 %v1995_v18, %v1994_v54 }
 0x29a   :  { %vm1890_vm2 = vcmp.gt.f32.partialorder %v1837_v55, 0.0  ;;  %v1922_v20 = vmul.f32 0.2, %v1837_v55  ;;  %v1841_v26 = vadd.f32 %v1840_v58, %v3804_v16 }
 0x29b   :  { %vm1891_vm3 = vcmp.gt.f32.partialorder %v1839_v19, 0.0  ;;  %v1923_v59 = vmul.f32 0.2, %v1839_v19  ;;  %2034 = vadd.xlane.f32.xlu0 %v2033_v3  ;;  %v1953_v4 = vsel %vm1889_vm1, %v1835_v35, %v1921_v9 }
 0x29c   :  { %vm1892_vm4 = vcmp.gt.f32.partialorder %v1841_v26, 0.0  ;;  %v1924_v21 = vmul.f32 0.2, %v1841_v26  ;;  %v1954_v27 = vsel %vm1890_vm2, %v1837_v55, %v1922_v20  ;;  %v1996_v56 = vmul.f32 %v3812_v22, %v1953_v4 }
 0x29d   :  { %v1997_v28 = vmul.f32 %v3816_v23, %v1954_v27  ;;  %v1955_v60 = vsel %vm1891_vm3, %v1839_v19, %v1923_v59 }
 0x29e   :  { %v1844_v61 = vpop.f32.mrb[52].mxu1  ;;  %v1956_v5 = vsel %vm1892_vm4, %v1841_v26, %v1924_v21  ;;  %v1998_v29 = vmul.f32 %v3812_v22, %v1955_v60 }
 0x29f   :  { %v1845_v62 = vadd.f32 %v1844_v61, %v3801_v49  ;;  %v1846_v30 = vpop.f32.mrb[53].mxu1  ;;  %v2036_v31 = vadd.f32 %v1997_v28, %v1996_v56  ;;  %v1999_v14 = vmul.f32 %v3816_v23, %v1956_v5 }
 0x2a0   :  { %v1847_v63 = vadd.f32 %v1846_v30, %v3804_v16  ;;  %v1848_v33 = vpop.f32.mrb[54].mxu1 }
 0x2a1   :  { %vm1893_vm5 = vcmp.gt.f32.partialorder %v1845_v62, 0.0  ;;  %v1925_v0 = vmul.f32 0.2, %v1845_v62  ;;  %v1849_v15 = vadd.f32 %v1848_v33, %v3801_v49  ;;  %v1850_v1 = vpop.f32.mrb[55].mxu1  ;;  %2037 = vadd.xlane.f32.xlu1 %v2036_v31  ;;  %v2039_v36 = vadd.f32 %v1999_v14, %v1998_v29 }
 0x2a2   :  { %vm1894_vm6 = vcmp.gt.f32.partialorder %v1847_v63, 0.0  ;;  %v1926_v46 = vmul.f32 0.2, %v1847_v63  ;;  %v1851_v38 = vadd.f32 %v1850_v1, %v3804_v16 }
 0x2a3   :  { %vm1895_vm7 = vcmp.gt.f32.partialorder %v1849_v15, 0.0  ;;  %v1927_v39 = vmul.f32 0.2, %v1849_v15  ;;  %2040 = vadd.xlane.f32.xlu0 %v2039_v36  ;;  %v1957_v17 = vsel %vm1893_vm5, %v1845_v62, %v1925_v0  ;;  %v3882_v0 = vld [vmem:[%s3916_s4 + $0x4] ss:$0 sm:$0xff]  ;;  %s2792_s4 = smov [#allocation2]  }
 0x2a4   :  { %vm1896_vm8 = vcmp.gt.f32.partialorder %v1851_v38, 0.0  ;;  %v1928_v40 = vmul.f32 0.2, %v1851_v38  ;;  %v1958_v41 = vsel %vm1894_vm6, %v1847_v63, %v1926_v46  ;;  %v2000_v42 = vmul.f32 %v3812_v22, %v1957_v17  ;;  %s2211_s6 = sshll.u32 %s2792_s4, 4  ;;  %s2212_s6 = int_to_ptr.vmem [resolvable:$true] %s2211_s6 }
 0x2a5   :  { %v2001_v10 = vmul.f32 %v3816_v23, %v1958_v41  ;;  %v1959_v43 = vsel %vm1895_vm7, %v1849_v15, %v1927_v39  ;;  %s2767_s7 = scalar_lea.vmem %s2212_s6, 16  ;;  %s2771_s2 = scalar_lea.vmem %s2212_s6, 32 }
 0x2a6   :  { %v1854_v44 = vpop.f32.mrb[56].mxu1  ;;  %v1960_v45 = vsel %vm1896_vm8, %v1851_v38, %v1928_v40  ;;  %v2002_v11 = vmul.f32 %v3812_v22, %v1959_v43  ;;  %p2768_p0 = scmp.ne.s32.totalorder %s2212_s6, %s2767_s7  ;;  %p2772_p1 = scmp.lt.s32.totalorder %s2212_s6, %s2212_s6 }
 0x2a7   :  { %v1855_v47 = vadd.f32 %v1854_v44, %v3801_v49  ;;  %v1856_v24 = vpop.f32.mrb[57].mxu1  ;;  %v2042_v48 = vadd.f32 %v2001_v10, %v2000_v42  ;;  %v2003_v12 = vmul.f32 %v3816_v23, %v1960_v45  ;;  %p2773_p2 = scmp.lt.s32.totalorder %s2771_s2, %s2767_s7 }
 0x2a8   :  { %v1857_v32 = vadd.f32 %v1856_v24, %v3804_v16  ;;  %v1858_v25 = vpop.f32.mrb[58].mxu1 }
 0x2a9   :  { %vm1897_vm9 = vcmp.gt.f32.partialorder %v1855_v47, 0.0  ;;  %v1929_v2 = vmul.f32 0.2, %v1855_v47  ;;  %v1859_v6 = vadd.f32 %v1858_v25, %v3801_v49  ;;  %v1860_v13 = vpop.f32.mrb[59].mxu1  ;;  %2043 = vadd.xlane.f32.xlu1 %v2042_v48  ;;  %v2045_v34 = vadd.f32 %v2003_v12, %v2002_v11  ;;  %p2774_p3 = por %p2773_p2, %p2772_p1 }
 0x2aa   :  { %vm1898_vm10 = vcmp.gt.f32.partialorder %v1857_v32, 0.0  ;;  %v1930_v50 = vmul.f32 0.2, %v1857_v32  ;;  %v1861_v51 = vadd.f32 %v1860_v13, %v3804_v16 }
 0x2ab   :  { %vm1899_vm11 = vcmp.gt.f32.partialorder %v1859_v6, 0.0  ;;  %v1931_v52 = vmul.f32 0.2, %v1859_v6  ;;  %2046 = vadd.xlane.f32.xlu0 %v2045_v34  ;;  %v1961_v7 = vsel %vm1897_vm9, %v1855_v47, %v1929_v2  ;;  %p2775_p4 = pnand %p2774_p3, %p2768_p0 }
 0x2ac   :  { %vm1900_vm12 = vcmp.gt.f32.partialorder %v1861_v51, 0.0  ;;  %v1932_v53 = vmul.f32 0.2, %v1861_v51  ;;  %v1962_v54 = vsel %vm1898_vm10, %v1857_v32, %v1930_v50  ;;  %v2004_v35 = vmul.f32 %v3812_v22, %v1961_v7 }
 0x2ad   :  { %v2005_v8 = vmul.f32 %v3816_v23, %v1962_v54  ;;  %v1963_v37 = vsel %vm1899_vm11, %v1859_v6, %v1931_v52 }
 0x2ae   :  { %v1864_v18 = vpop.f32.mrb[60].mxu1  ;;  %v1964_v55 = vsel %vm1900_vm12, %v1861_v51, %v1932_v53  ;;  %v2006_v57 = vmul.f32 %v3812_v22, %v1963_v37 }
 0x2af   :  { %v1865_v9 = vadd.f32 %v1864_v18, %v3801_v49  ;;  %v1866_v19 = vpop.f32.mrb[61].mxu1  ;;  %v2048_v58 = vadd.f32 %v2005_v8, %v2004_v35  ;;  %v2007_v3 = vmul.f32 %v3816_v23, %v1964_v55 }
 0x2b0   :  { %v1867_v20 = vadd.f32 %v1866_v19, %v3804_v16  ;;  %v1868_v26 = vpop.f32.mrb[62].mxu1 }
 0x2b1   :  { %vm1901_vm13 = vcmp.gt.f32.partialorder %v1865_v9, 0.0  ;;  %v1933_v59 = vmul.f32 0.2, %v1865_v9  ;;  %v1869_v4 = vadd.f32 %v1868_v26, %v3801_v49  ;;  %v1870_v21 = vpop.f32.mrb[63].mxu1  ;;  %2049 = vadd.xlane.f32.xlu1 %v2048_v58  ;;  %v2051_v27 = vadd.f32 %v2007_v3, %v2006_v57 }
 0x2b2   :  { %vm1902_vm14 = vcmp.gt.f32.partialorder %v1867_v20, 0.0  ;;  %v1934_v56 = vmul.f32 0.2, %v1867_v20  ;;  %v1871_v28 = vadd.f32 %v1870_v21, %v3804_v16 }
 0x2b3   :  { %vm1903_vm15 = vcmp.gt.f32.partialorder %v1869_v4, 0.0  ;;  %v1935_v60 = vmul.f32 0.2, %v1869_v4  ;;  %2052 = vadd.xlane.f32.xlu0 %v2051_v27  ;;  %v1965_v61 = vsel %vm1901_vm13, %v1865_v9, %v1933_v59 }
 0x2b4   :  { %vm1904_vm0 = vcmp.gt.f32.partialorder %v1871_v28, 0.0  ;;  %v1936_v5 = vmul.f32 0.2, %v1871_v28  ;;  %v1966_v29 = vsel %vm1902_vm14, %v1867_v20, %v1934_v56  ;;  %v2008_v62 = vmul.f32 %v3812_v22, %v1965_v61 }
 0x2b5   :  { %v2009_v30 = vmul.f32 %v3816_v23, %v1966_v29  ;;  %v1967_v31 = vsel %vm1903_vm15, %v1869_v4, %v1935_v60 }
 0x2b6   :  { %v1968_v49 = vsel %vm1904_vm0, %v1871_v28, %v1936_v5  ;;  %v2010_v14 = vmul.f32 %v3812_v22, %v1967_v31 }
 0x2b7   :  { %v2054_v63 = vadd.f32 %v2009_v30, %v2008_v62  ;;  %v2011_v33 = vmul.f32 %v3816_v23, %v1968_v49 }
 0x2b9   :  { %2055 = vadd.xlane.f32.xlu1 %v2054_v63  ;;  %v2057_v16 = vadd.f32 %v2011_v33, %v2010_v14 }
 0x2bb   :  { %2058 = vadd.xlane.f32.xlu0 %v2057_v16 }
 0x30e   :  { %v2014_v15 = vpop.xlane.xlu0 %2013 }
 0x30f   :  { %v2060_v1 = vadd.f32 %v2014_v15, %v3882_v0 }
 0x310   :  { %v2017_v36 = vpop.xlane.xlu1 %2016 }
 0x311   :  { %v2360_v46 = vmul.f32 -1.442695, %v2060_v1  ;;  %v2061_v38 = vadd.f32 %v2017_v36, %v3882_v0 }
 0x313   :  { %2703 = vpow2.f32 %v2360_v46  ;;  %v2361_v22 = vmul.f32 -1.442695, %v2061_v38 }
 0x315   :  { %2705 = vpow2.f32 %v2361_v22 }
 0x316   :  { %v2020_v39 = vpop.xlane.xlu0 %2019 }
 0x317   :  { %v2062_v23 = vadd.f32 %v2020_v39, %v3882_v0 }
 0x319   :  { %v2362_v17 = vmul.f32 -1.442695, %v2062_v23 }
 0x31a   :  { %v2023_v40 = vpop.xlane.xlu0 %2022 }
 0x31b   :  { %2707 = vpow2.f32 %v2362_v17  ;;  %v2063_v41 = vadd.f32 %v2023_v40, %v3882_v0 }
 0x31d   :  { %v2704_v42 = vpop.eup %2703  ;;  %v2363_v10 = vmul.f32 -1.442695, %v2063_v41 }
 0x31e   :  { %v2124_v43 = vadd.f32 1.0, %v2704_v42  ;;  %v2026_v44 = vpop.xlane.xlu1 %2025 }
 0x31f   :  { %v2706_v45 = vpop.eup %2705  ;;  %2709 = vpow2.f32 %v2363_v10  ;;  %v2064_v11 = vadd.f32 %v2026_v44, %v3882_v0 }
 0x320   :  { %2711 = vrcp.f32 %v2124_v43  ;;  %v2125_v47 = vadd.f32 1.0, %v2706_v45  ;;  %v2029_v24 = vpop.xlane.xlu0 %2028 }
 0x321   :  { %v2364_v48 = vmul.f32 -1.442695, %v2064_v11  ;;  %v2065_v12 = vadd.f32 %v2029_v24, %v3882_v0 }
 0x323   :  { %2713 = vpow2.f32 %v2364_v48  ;;  %v2365_v32 = vmul.f32 -1.442695, %v2065_v12 }
 0x324   :  { %2715 = vrcp.f32 %v2125_v47 }
 0x325   :  { %v2708_v25 = vpop.eup %2707  ;;  %2717 = vpow2.f32 %v2365_v32 }
 0x326   :  { %v2126_v2 = vadd.f32 1.0, %v2708_v25  ;;  %v2032_v6 = vpop.xlane.xlu1 %2031 }
 0x327   :  { %v2066_v13 = vadd.f32 %v2032_v6, %v3882_v0 }
 0x328   :  { %2719 = vrcp.f32 %v2126_v2  ;;  %v2035_v34 = vpop.xlane.xlu0 %2034 }
 0x329   :  { %v2710_v50 = vpop.eup %2709  ;;  %v2366_v51 = vmul.f32 -1.442695, %v2066_v13  ;;  %v2067_v52 = vadd.f32 %v2035_v34, %v3882_v0 }
 0x32a   :  { %v2712_v7 = vpop.eup %2711  ;;  %v2127_v53 = vadd.f32 1.0, %v2710_v50 }
 0x32b   :  { %2721 = vpow2.f32 %v2366_v51  ;;  %v2367_v54 = vmul.f32 -1.442695, %v2067_v52  ;;  %2172 = vxpose.xlu1.b32.start [1/16] (narrow) %v2712_v7, 8 }
 0x32c   :  { %2723 = vrcp.f32 %v2127_v53 }
 0x32d   :  { %v2714_v35 = vpop.eup %2713  ;;  %2725 = vpow2.f32 %v2367_v54 }
 0x32e   :  { %v2716_v8 = vpop.eup %2715  ;;  %v2128_v37 = vadd.f32 1.0, %v2714_v35  ;;  %v2038_v18 = vpop.xlane.xlu1 %2037 }
 0x32f   :  { %v2718_v55 = vpop.eup %2717  ;;  %v2068_v57 = vadd.f32 %v2038_v18, %v3882_v0  ;;  %2173 = vxpose.xlu1.b32.cont [2/16] (narrow) %v2716_v8, 8 }
 0x330   :  { %2727 = vrcp.f32 %v2128_v37  ;;  %v2129_v9 = vadd.f32 1.0, %v2718_v55  ;;  %v2041_v19 = vpop.xlane.xlu0 %2040 }
 0x331   :  { %v2368_v58 = vmul.f32 -1.442695, %v2068_v57  ;;  %v2069_v3 = vadd.f32 %v2041_v19, %v3882_v0 }
 0x332   :  { %v2720_v20 = vpop.eup %2719 }
 0x333   :  { %2729 = vpow2.f32 %v2368_v58  ;;  %v2369_v26 = vmul.f32 -1.442695, %v2069_v3  ;;  %2174 = vxpose.xlu1.b32.cont [3/16] (narrow) %v2720_v20, 8 }
 0x334   :  { %2731 = vrcp.f32 %v2129_v9 }
 0x335   :  { %v2722_v59 = vpop.eup %2721  ;;  %2733 = vpow2.f32 %v2369_v26 }
 0x336   :  { %v2724_v4 = vpop.eup %2723  ;;  %v2130_v21 = vadd.f32 1.0, %v2722_v59  ;;  %v2044_v27 = vpop.xlane.xlu1 %2043 }
 0x337   :  { %v2726_v56 = vpop.eup %2725  ;;  %v2070_v28 = vadd.f32 %v2044_v27, %v3882_v0  ;;  %2175 = vxpose.xlu1.b32.cont [4/16] (narrow) %v2724_v4, 8 }
 0x338   :  { %2735 = vrcp.f32 %v2130_v21  ;;  %v2131_v60 = vadd.f32 1.0, %v2726_v56  ;;  %v2047_v61 = vpop.xlane.xlu0 %2046 }
 0x339   :  { %v2370_v5 = vmul.f32 -1.442695, %v2070_v28  ;;  %v2071_v29 = vadd.f32 %v2047_v61, %v3882_v0 }
 0x33a   :  { %v2728_v62 = vpop.eup %2727 }
 0x33b   :  { %2737 = vpow2.f32 %v2370_v5  ;;  %v2371_v30 = vmul.f32 -1.442695, %v2071_v29  ;;  %2176 = vxpose.xlu1.b32.cont [5/16] (narrow) %v2728_v62, 8 }
 0x33c   :  { %2739 = vrcp.f32 %v2131_v60 }
 0x33d   :  { %v2730_v31 = vpop.eup %2729  ;;  %2741 = vpow2.f32 %v2371_v30 }
 0x33e   :  { %v2732_v49 = vpop.eup %2731  ;;  %v2132_v14 = vadd.f32 1.0, %v2730_v31  ;;  %v2050_v63 = vpop.xlane.xlu1 %2049 }
 0x33f   :  { %v2734_v33 = vpop.eup %2733  ;;  %v2072_v16 = vadd.f32 %v2050_v63, %v3882_v0  ;;  %2177 = vxpose.xlu1.b32.cont [6/16] (narrow) %v2732_v49, 8 }
 0x340   :  { %2743 = vrcp.f32 %v2132_v14  ;;  %v2133_v15 = vadd.f32 1.0, %v2734_v33  ;;  %v2053_v1 = vpop.xlane.xlu0 %2052 }
 0x341   :  { %v2372_v36 = vmul.f32 -1.442695, %v2072_v16  ;;  %v2073_v46 = vadd.f32 %v2053_v1, %v3882_v0 }
 0x342   :  { %v2736_v38 = vpop.eup %2735 }
 0x343   :  { %2745 = vpow2.f32 %v2372_v36  ;;  %v2373_v22 = vmul.f32 -1.442695, %v2073_v46  ;;  %2178 = vxpose.xlu1.b32.cont [7/16] (narrow) %v2736_v38, 8 }
 0x344   :  { %2747 = vrcp.f32 %v2133_v15 }
 0x345   :  { %v2738_v39 = vpop.eup %2737  ;;  %2749 = vpow2.f32 %v2373_v22 }
 0x346   :  { %v2740_v23 = vpop.eup %2739  ;;  %v2134_v17 = vadd.f32 1.0, %v2738_v39  ;;  %v2056_v40 = vpop.xlane.xlu1 %2055 }
 0x347   :  { %v2742_v41 = vpop.eup %2741  ;;  %v2074_v42 = vadd.f32 %v2056_v40, %v3882_v0  ;;  %2179 = vxpose.xlu1.b32.cont [8/16] (narrow) %v2740_v23, 8 }
 0x348   :  { %2751 = vrcp.f32 %v2134_v17  ;;  %v2135_v10 = vadd.f32 1.0, %v2742_v41  ;;  %v2059_v43 = vpop.xlane.xlu0 %2058 }
 0x349   :  { %v2374_v44 = vmul.f32 -1.442695, %v2074_v42  ;;  %v2075_v45 = vadd.f32 %v2059_v43, %v3882_v0 }
 0x34a   :  { %v2744_v11 = vpop.eup %2743 }
 0x34b   :  { %2753 = vpow2.f32 %v2374_v44  ;;  %v2375_v47 = vmul.f32 -1.442695, %v2075_v45  ;;  %2180 = vxpose.xlu1.b32.cont [9/16] (narrow) %v2744_v11, 8 }
 0x34c   :  { %2755 = vrcp.f32 %v2135_v10 }
 0x34d   :  { %v2746_v24 = vpop.eup %2745  ;;  %2757 = vpow2.f32 %v2375_v47 }
 0x34e   :  { %v2748_v48 = vpop.eup %2747  ;;  %v2136_v12 = vadd.f32 1.0, %v2746_v24 }
 0x34f   :  { %v2750_v32 = vpop.eup %2749  ;;  %2181 = vxpose.xlu1.b32.cont [10/16] (narrow) %v2748_v48, 8 }
 0x350   :  { %2759 = vrcp.f32 %v2136_v12  ;;  %v2137_v25 = vadd.f32 1.0, %v2750_v32 }
 0x352   :  { %v2752_v2 = vpop.eup %2751  ;;  %2761 = vrcp.f32 %v2137_v25 }
 0x353   :  { %2182 = vxpose.xlu1.b32.cont [11/16] (narrow) %v2752_v2, 8 }
 0x355   :  { %v2754_v6 = vpop.eup %2753 }
 0x356   :  { %v2756_v13 = vpop.eup %2755  ;;  %v2138_v34 = vadd.f32 1.0, %v2754_v6 }
 0x357   :  { %v2758_v0 = vpop.eup %2757  ;;  %2183 = vxpose.xlu1.b32.cont [12/16] (narrow) %v2756_v13, 8 }
 0x358   :  { %2763 = vrcp.f32 %v2138_v34  ;;  %v2139_v50 = vadd.f32 1.0, %v2758_v0 }
 0x35a   :  { %v2760_v51 = vpop.eup %2759  ;;  %2765 = vrcp.f32 %v2139_v50 }
 0x35b   :  { %2184 = vxpose.xlu1.b32.cont [13/16] (narrow) %v2760_v51, 8 }
 0x35c   :  { %v2762_v52 = vpop.eup %2761 }
 0x35f   :  { %2185 = vxpose.xlu1.b32.cont [14/16] (narrow) %v2762_v52, 8 }
 0x362   :  { %v2764_v7 = vpop.eup %2763 }
 0x363   :  { %2186 = vxpose.xlu1.b32.cont [15/16] (narrow) %v2764_v7, 8 }
 0x364   :  { %v2766_v53 = vpop.eup %2765 }
 0x367   :  { %2187 = vxpose.xlu1.b32.end [16/16] (narrow) %v2766_v53, 8 }
 0x3ab   :  { %v2188_v54 = vpop.trf.xlu1 }
 0x3ac   :  { %2204 = vst [vmem:[#allocation2] sm:$0x1] %v2188_v54 }
 0x3ad   :  { %2778 = shalt.err (!%p2775_p4)
}
 0x3ae   :  { %s2779_s9 = scalar_lea.hbm %s3917_s5, 16 }
 0x3af   :  { %p2780_p5 = scmp.ne.s32.totalorder %s3917_s5, %s2779_s9  ;;  %p2783_p6 = scmp.lt.u32.totalorder %s2779_s9, %s3917_s5 }
 0x3b1   :  { %p2785_p7 = pnand %p2783_p6, %p2780_p5 }
 0x3b3   :  { %2788 = shalt.err (!%p2785_p7)
}
 0x3b4   :  { %2214 = dma.vmem_to_hbm [thread:$0]  %s2212_s6, 16, %s3917_s5, [#allocation3]  }
 0x3b5   :  { %2789 = dma.done.wait [#allocation3], 16  }
 0x3b6   :  { %2790 = vsyncadd [#allocation3], 4294967280 }
 0x3b7   :  { %2218 = vsyncpa [#allocation3], 1 }

</bundles_post_ra>
